<compile_context>
chip_gen: v6e
topology: v6e:2x2x1
jax: 0.10.0
libtpu: 0.0.40
codegen_flags: <defaults>
</compile_context>

<pallas_src>
import numpy as np
import jax
import jax.numpy as jnp
from jax import lax
from jax.experimental import pallas as pl
from jax.experimental.pallas import tpu as pltpu


# ----------------------------------------------------------------------------
# Constant spatial operators (built on host at trace time; depend only on H, W).
# ----------------------------------------------------------------------------
def _shift_operators(H, W):
    """Separable masked-shift operators (zero padding folded in).

    Returns (mx, my), each (2, L, L) 0/1 matrices with
      (x @ mx[0])[c, p] = x[c, (h, w-1)]   (0 outside the image)
      (x @ mx[1])[c, p] = x[c, (h, w+1)]
      (x @ my[0])[c, p] = x[c, (h-1, w)]
      (x @ my[1])[c, p] = x[c, (h+1, w)]
    """
    L = H * W
    p = np.arange(L)
    h, w = p // W, p % W

    def op(dy, dx):
        m = np.zeros((L, L), np.float32)
        hh, ww = h + dy, w + dx
        valid = (hh >= 0) & (hh < H) & (ww >= 0) & (ww < W)
        m[(hh * W + ww)[valid], p[valid]] = 1.0
        return m

    mx = np.stack([op(0, -1), op(0, +1)])
    my = np.stack([op(-1, 0), op(+1, 0)])
    return mx, my


def _pool_select_operators(H, W):
    """(4, L, L//4) 0/1 matrices picking the 4 corners of every 2x2 block."""
    Ho, Wo = H // 2, W // 2
    L, Lo = H * W, Ho * Wo
    sel = np.zeros((4, L, Lo), np.float32)
    q = np.arange(Lo)
    i, j = q // Wo, q % Wo
    for k, (di, dj) in enumerate(((0, 0), (0, 1), (1, 0), (1, 1))):
        sel[k, (2 * i + di) * W + (2 * j + dj), q] = 1.0
    return sel


# ----------------------------------------------------------------------------
# Fused kernel: conv1 + pool + conv2 + pool + channel attention + scale.
# ----------------------------------------------------------------------------
def _trans_ca_kernel(x_ref, w1_ref, b1_ref, w2_ref, b2_ref,
                     mx1_ref, my1_ref, s1_ref,
                     mx2_ref, my2_ref, s2_ref,
                     q_ref, wk_ref, wv_ref, wd_ref, bd_ref, o_ref):
    f32 = jnp.float32
    x = x_ref[0].astype(f32)                                   # (C, H*W), lanes = spatial

    def conv3x3_relu(z, w_ref_, b_ref_, mx_ref_, my_ref_):
        # Separable 3x3: y = sum_dy ( sum_dx W[dy,dx] @ (z @ Mx[dx]) ) @ My[dy].
        zxm = jnp.dot(z, mx_ref_[0], preferred_element_type=f32)     # (h, w-1)
        zxp = jnp.dot(z, mx_ref_[1], preferred_element_type=f32)     # (h, w+1)

        def row_mix(dy):                                             # dy in {-1,0,+1}
            k0 = (dy + 1) * 3                                        # tap k = (dy+1)*3+(dx+1)
            return (jnp.dot(w_ref_[k0 + 0], zxm, preferred_element_type=f32)
                    + jnp.dot(w_ref_[k0 + 1], z, preferred_element_type=f32)
                    + jnp.dot(w_ref_[k0 + 2], zxp, preferred_element_type=f32))

        y = (jnp.dot(row_mix(-1), my_ref_[0], preferred_element_type=f32)
             + row_mix(0)
             + jnp.dot(row_mix(+1), my_ref_[1], preferred_element_type=f32))
        return jnp.maximum(y + b_ref_[...], 0.0)                      # bias + ReLU

    def maxpool2x2(z, sel_ref_):
        # Compact each 2x2 corner with a 0/1 selection matmul, then elementwise max.
        p00 = jnp.dot(z, sel_ref_[0], preferred_element_type=f32)
        p01 = jnp.dot(z, sel_ref_[1], preferred_element_type=f32)
        p10 = jnp.dot(z, sel_ref_[2], preferred_element_type=f32)
        p11 = jnp.dot(z, sel_ref_[3], preferred_element_type=f32)
        return jnp.maximum(jnp.maximum(p00, p01), jnp.maximum(p10, p11))

    # conv1 -> pool -> conv2 -> pool, all resident in VMEM.
    y = conv3x3_relu(x, w1_ref, b1_ref, mx1_ref, my1_ref)      # (C, H*W)
    y = maxpool2x2(y, s1_ref)                                  # (C, H*W/4)
    y = conv3x3_relu(y, w2_ref, b2_ref, mx2_ref, my2_ref)      # (C, H*W/4)
    x1 = maxpool2x2(y, s2_ref)                                 # (C, N), N = H*W/16

    # Channel attention. x1 here is the transposed (c, n) view of torch's (n, c).
    key = jnp.dot(wk_ref[...], x1, preferred_element_type=f32)      # (C, N)
    val = jnp.dot(wv_ref[...], x1, preferred_element_type=f32)      # (C, N)
    scores = jnp.dot(q_ref[...], key, preferred_element_type=f32)   # (C, N)
    m = jnp.max(scores, axis=-1, keepdims=True)
    e = jnp.exp(scores - m)
    attn = e * pl.reciprocal(jnp.sum(e, axis=-1, keepdims=True), approx=True)
    out = lax.dot_general(attn, val, (((1,), (1,)), ((), ())),
                          preferred_element_type=f32)                # (C, C)
    # per-row Linear(dim, 1): res[i] = out[i, :] @ wd[i, :] + bd[i]
    res = jnp.sum(out * wd_ref[...], axis=-1, keepdims=True) + bd_ref[...]   # (C, 1)
    scale = jnp.maximum(res, 0.0) + 1.0                                      # (C, 1)

    # Final broadcast multiply: lane-dense (C, H*W) store.
    o_ref[0] = (x * scale).astype(o_ref.dtype)


# ----------------------------------------------------------------------------
# Wrapper: only free reshapes + parameter repacking + constant operator build.
# ----------------------------------------------------------------------------
def trans_ca_forward(x_nchw, params):
    B, C, H, W = x_nchw.shape
    assert H % 4 == 0 and W % 4 == 0, "two 2x2 max-pools need H, W divisible by 4"
    L1 = H * W
    L2 = (H // 2) * (W // 2)
    N = (H // 4) * (W // 4)

    # Constant spatial operators (trace-time constants).
    mx1_np, my1_np = _shift_operators(H, W)                    # (2, L1, L1) each
    mx2_np, my2_np = _shift_operators(H // 2, W // 2)          # (2, L2, L2) each
    s1_np = _pool_select_operators(H, W)                       # (4, L1, L2)
    s2_np = _pool_select_operators(H // 2, W // 2)             # (4, L2, N)
    mx1, my1, mx2, my2, s1, s2 = map(
        jnp.asarray, (mx1_np, my1_np, mx2_np, my2_np, s1_np, s2_np))

    # Conv weights (C_out, C_in, 3, 3) -> (9, C_out, C_in); biases -> (C, 1).
    w1 = jnp.transpose(params["conv1_w"].reshape(C, C, 9), (2, 0, 1))
    w2 = jnp.transpose(params["conv2_w"].reshape(C, C, 9), (2, 0, 1))
    b1 = params["conv1_b"].reshape(C, 1)
    b2 = params["conv2_b"].reshape(C, 1)
    bd = params["bd"].reshape(C, 1)

    x_flat = x_nchw.reshape(B, C, L1)       # NCHW flattened == (C, H*W): free reshape

    def full(shape):
        return pl.BlockSpec(shape, lambda b, _n=len(shape): (0,) * _n)

    out_flat = pl.pallas_call(
        _trans_ca_kernel,
        out_shape=jax.ShapeDtypeStruct((B, C, L1), jnp.float32),
        grid_spec=pltpu.PrefetchScalarGridSpec(
            num_scalar_prefetch=0,
            grid=(B,),
            in_specs=[
                pl.BlockSpec((1, C, L1), lambda b: (b, 0, 0)),   # x (one batch elem)
                full((9, C, C)),      # conv1 per-tap channel weights
                full((C, 1)),         # conv1 bias
                full((9, C, C)),      # conv2 per-tap channel weights
                full((C, 1)),         # conv2 bias
                full((2, L1, L1)),    # level-1 horizontal masked shifts
                full((2, L1, L1)),    # level-1 vertical masked shifts
                full((4, L1, L2)),    # level-1 pool corner selectors
                full((2, L2, L2)),    # level-2 horizontal masked shifts
                full((2, L2, L2)),    # level-2 vertical masked shifts
                full((4, L2, N)),     # level-2 pool corner selectors
                full((C, C)),         # query parameter
                full((C, C)),         # key_linear weight (out, in)
                full((C, C)),         # value_linear weight (out, in)
                full((C, C)),         # stacked dim_linear weights
                full((C, 1)),         # stacked dim_linear biases
            ],
            out_specs=pl.BlockSpec((1, C, L1), lambda b: (b, 0, 0)),
        ),
        compiler_params=pltpu.CompilerParams(
            dimension_semantics=("parallel",)),
    )(x_flat, w1, b1, w2, b2, mx1, my1, s1, mx2, my2, s2,
      params["query"], params["wk"], params["wv"], params["wd"], bd)

    return out_flat.reshape(B, C, H, W)


# ----------------------------------------------------------------------------
# Pure-JAX reference (mirrors the PyTorch module).
# ----------------------------------------------------------------------------
def ref_forward(x_nchw, params):
    def conv3x3_relu(z, w, b):
        y = lax.conv_general_dilated(
            z, w, window_strides=(1, 1), padding=((1, 1), (1, 1)),
            dimension_numbers=("NCHW", "OIHW", "NCHW"))
        return jnp.maximum(y + b[None, :, None, None], 0.0)

    def maxpool2x2(z):
        b_, c_, h_, w_ = z.shape
        return z.reshape(b_, c_, h_ // 2, 2, w_ // 2, 2).max(axis=(3, 5))

    x1 = maxpool2x2(conv3x3_relu(x_nchw, params["conv1_w"], params["conv1_b"]))
    x1 = maxpool2x2(conv3x3_relu(x1, params["conv2_w"], params["conv2_b"]))
    b, c, h, w = x1.shape
    x1 = jnp.transpose(x1, (0, 2, 3, 1)).reshape(b, h * w, c)
    key = x1 @ params["wk"].T                                   # Linear, no bias
    val = x1 @ params["wv"].T
    q = jnp.broadcast_to(params["query"], (b, c, c))
    attn = jax.nn.softmax(jnp.einsum("bic,bnc->bin", q, key), axis=-1)
    out = jnp.einsum("bin,bnc->bic", attn, val)
    res = jnp.sum(out * params["wd"][None], axis=-1) + params["bd"][None]
    scale = jnp.maximum(res, 0.0) + 1.0
    return x_nchw * scale[:, :, None, None]


if __name__ == "__main__":
    B, C, H, W = 2, 4, 16, 16                  # dim = C = 4
    key = jax.random.PRNGKey(0)
    ks = jax.random.split(key, 10)
    params = {
        "conv1_w": jax.random.normal(ks[0], (C, C, 3, 3), jnp.float32) * 0.2,
        "conv1_b": jax.random.normal(ks[1], (C,), jnp.float32) * 0.1,
        "conv2_w": jax.random.normal(ks[2], (C, C, 3, 3), jnp.float32) * 0.2,
        "conv2_b": jax.random.normal(ks[3], (C,), jnp.float32) * 0.1,
        # nn.Parameter(torch.ones) at init, but learnable -> use a generic value.
        "query": jax.random.normal(ks[4], (C, C), jnp.float32) * 0.5 + 1.0,
        "wk": jax.random.normal(ks[5], (C, C), jnp.float32) * 0.3,   # (out, in)
        "wv": jax.random.normal(ks[6], (C, C), jnp.float32) * 0.3,   # (out, in)
        "wd": jax.random.normal(ks[7], (C, C), jnp.float32) * 0.3,   # stacked dim_linear
        "bd": jax.random.normal(ks[8], (C,), jnp.float32) * 0.1,
    }
    x = jax.random.normal(ks[9], (B, C, H, W), jnp.float32)

    out = jax.block_until_ready(jax.jit(trans_ca_forward)(x, params))
    ref = ref_forward(x, params)
    assert out.shape == (B, C, H, W)
    # Tolerance covers the EUP approximate reciprocal used for the softmax denom.
    if not jnp.allclose(out, ref, rtol=1e-2, atol=1e-2):
        raise AssertionError(
            "Pallas kernel output mismatch vs JAX reference; max abs diff = "
            f"{jnp.max(jnp.abs(out - ref))}")
    print("KERNEL_OK")
</pallas_src>

<mosaic_0001>
module attributes {stable_mosaic.version = 11 : i64} {
  func.func @_trans_ca_kernel(%arg0: i32, %arg1: memref<1x4x256xf32, #tpu.memory_space<vmem>>, %arg2: memref<9x4x4xf32, #tpu.memory_space<vmem>>, %arg3: memref<4x1xf32, #tpu.memory_space<vmem>>, %arg4: memref<9x4x4xf32, #tpu.memory_space<vmem>>, %arg5: memref<4x1xf32, #tpu.memory_space<vmem>>, %arg6: memref<2x256x256xf32, #tpu.memory_space<vmem>>, %arg7: memref<2x256x256xf32, #tpu.memory_space<vmem>>, %arg8: memref<4x256x64xf32, #tpu.memory_space<vmem>>, %arg9: memref<2x64x64xf32, #tpu.memory_space<vmem>>, %arg10: memref<2x64x64xf32, #tpu.memory_space<vmem>>, %arg11: memref<4x64x16xf32, #tpu.memory_space<vmem>>, %arg12: memref<4x4xf32, #tpu.memory_space<vmem>>, %arg13: memref<4x4xf32, #tpu.memory_space<vmem>>, %arg14: memref<4x4xf32, #tpu.memory_space<vmem>>, %arg15: memref<4x4xf32, #tpu.memory_space<vmem>>, %arg16: memref<4x1xf32, #tpu.memory_space<vmem>>, %arg17: memref<1x4x256xf32, #tpu.memory_space<vmem>>) attributes {dimension_semantics = [#tpu.dimension_semantics<parallel>], iteration_bounds = array<i64: 2>, scalar_prefetch = 0 : i64, scratch_operands = 0 : i64, tpu.core_type = #tpu.core_type<tc>, window_params = [{transform_indices = @transform_0, window_bounds = array<i64: 1, 4, 256>}, {pipeline_mode = #tpu.pipeline_mode<synchronous>, transform_indices = @transform_1, window_bounds = array<i64: 9, 4, 4>}, {pipeline_mode = #tpu.pipeline_mode<synchronous>, transform_indices = @transform_2, window_bounds = array<i64: 4, 1>}, {pipeline_mode = #tpu.pipeline_mode<synchronous>, transform_indices = @transform_3, window_bounds = array<i64: 9, 4, 4>}, {pipeline_mode = #tpu.pipeline_mode<synchronous>, transform_indices = @transform_4, window_bounds = array<i64: 4, 1>}, {pipeline_mode = #tpu.pipeline_mode<synchronous>, transform_indices = @transform_5, window_bounds = array<i64: 2, 256, 256>}, {pipeline_mode = #tpu.pipeline_mode<synchronous>, transform_indices = @transform_6, window_bounds = array<i64: 2, 256, 256>}, {pipeline_mode = #tpu.pipeline_mode<synchronous>, transform_indices = @transform_7, window_bounds = array<i64: 4, 256, 64>}, {pipeline_mode = #tpu.pipeline_mode<synchronous>, transform_indices = @transform_8, window_bounds = array<i64: 2, 64, 64>}, {pipeline_mode = #tpu.pipeline_mode<synchronous>, transform_indices = @transform_9, window_bounds = array<i64: 2, 64, 64>}, {pipeline_mode = #tpu.pipeline_mode<synchronous>, transform_indices = @transform_10, window_bounds = array<i64: 4, 64, 16>}, {pipeline_mode = #tpu.pipeline_mode<synchronous>, transform_indices = @transform_11, window_bounds = array<i64: 4, 4>}, {pipeline_mode = #tpu.pipeline_mode<synchronous>, transform_indices = @transform_12, window_bounds = array<i64: 4, 4>}, {pipeline_mode = #tpu.pipeline_mode<synchronous>, transform_indices = @transform_13, window_bounds = array<i64: 4, 4>}, {pipeline_mode = #tpu.pipeline_mode<synchronous>, transform_indices = @transform_14, window_bounds = array<i64: 4, 4>}, {pipeline_mode = #tpu.pipeline_mode<synchronous>, transform_indices = @transform_15, window_bounds = array<i64: 4, 1>}, {transform_indices = @transform_16, window_bounds = array<i64: 1, 4, 256>}]} {
    %c0 = arith.constant 0 : index
    %c0_0 = arith.constant 0 : index
    %c0_1 = arith.constant 0 : index
    %0 = vector.load %arg1[%c0, %c0_0, %c0_1] : memref<1x4x256xf32, #tpu.memory_space<vmem>>, vector<1x4x256xf32>
    %1 = vector.shape_cast %0 : vector<1x4x256xf32> to vector<4x256xf32>
    %c0_2 = arith.constant 0 : index
    %c0_3 = arith.constant 0 : index
    %c0_4 = arith.constant 0 : index
    %2 = vector.load %arg6[%c0_2, %c0_3, %c0_4] : memref<2x256x256xf32, #tpu.memory_space<vmem>>, vector<1x256x256xf32>
    %3 = vector.shape_cast %2 : vector<1x256x256xf32> to vector<256x256xf32>
    %cst = arith.constant dense<0.000000e+00> : vector<4x256xf32>
    %4 = tpu.matmul %1, %3, %cst {dimension_numbers = #tpu.dot_dimension_numbers<[1], [0], [0], [1], [0, 0, 1, 1], [], []>} : vector<4x256xf32>, vector<256x256xf32>, vector<4x256xf32> -> vector<4x256xf32>
    %c1 = arith.constant 1 : index
    %c0_5 = arith.constant 0 : index
    %c0_6 = arith.constant 0 : index
    %5 = vector.load %arg6[%c1, %c0_5, %c0_6] : memref<2x256x256xf32, #tpu.memory_space<vmem>>, vector<1x256x256xf32>
    %6 = vector.shape_cast %5 : vector<1x256x256xf32> to vector<256x256xf32>
    %cst_7 = arith.constant dense<0.000000e+00> : vector<4x256xf32>
    %7 = tpu.matmul %1, %6, %cst_7 {dimension_numbers = #tpu.dot_dimension_numbers<[1], [0], [0], [1], [0, 0, 1, 1], [], []>} : vector<4x256xf32>, vector<256x256xf32>, vector<4x256xf32> -> vector<4x256xf32>
    %c0_8 = arith.constant 0 : index
    %c0_9 = arith.constant 0 : index
    %c0_10 = arith.constant 0 : index
    %8 = vector.load %arg2[%c0_8, %c0_9, %c0_10] : memref<9x4x4xf32, #tpu.memory_space<vmem>>, vector<1x4x4xf32>
    %9 = vector.shape_cast %8 : vector<1x4x4xf32> to vector<4x4xf32>
    %cst_11 = arith.constant dense<0.000000e+00> : vector<4x256xf32>
    %10 = tpu.matmul %9, %4, %cst_11 {dimension_numbers = #tpu.dot_dimension_numbers<[1], [0], [0], [1], [0, 0, 1, 1], [], []>} : vector<4x4xf32>, vector<4x256xf32>, vector<4x256xf32> -> vector<4x256xf32>
    %c1_12 = arith.constant 1 : index
    %c0_13 = arith.constant 0 : index
    %c0_14 = arith.constant 0 : index
    %11 = vector.load %arg2[%c1_12, %c0_13, %c0_14] : memref<9x4x4xf32, #tpu.memory_space<vmem>>, vector<1x4x4xf32>
    %12 = vector.shape_cast %11 : vector<1x4x4xf32> to vector<4x4xf32>
    %cst_15 = arith.constant dense<0.000000e+00> : vector<4x256xf32>
    %13 = tpu.matmul %12, %1, %cst_15 {dimension_numbers = #tpu.dot_dimension_numbers<[1], [0], [0], [1], [0, 0, 1, 1], [], []>} : vector<4x4xf32>, vector<4x256xf32>, vector<4x256xf32> -> vector<4x256xf32>
    %14 = arith.addf %10, %13 : vector<4x256xf32>
    %c2 = arith.constant 2 : index
    %c0_16 = arith.constant 0 : index
    %c0_17 = arith.constant 0 : index
    %15 = vector.load %arg2[%c2, %c0_16, %c0_17] : memref<9x4x4xf32, #tpu.memory_space<vmem>>, vector<1x4x4xf32>
    %16 = vector.shape_cast %15 : vector<1x4x4xf32> to vector<4x4xf32>
    %cst_18 = arith.constant dense<0.000000e+00> : vector<4x256xf32>
    %17 = tpu.matmul %16, %7, %cst_18 {dimension_numbers = #tpu.dot_dimension_numbers<[1], [0], [0], [1], [0, 0, 1, 1], [], []>} : vector<4x4xf32>, vector<4x256xf32>, vector<4x256xf32> -> vector<4x256xf32>
    %18 = arith.addf %14, %17 : vector<4x256xf32>
    %c0_19 = arith.constant 0 : index
    %c0_20 = arith.constant 0 : index
    %c0_21 = arith.constant 0 : index
    %19 = vector.load %arg7[%c0_19, %c0_20, %c0_21] : memref<2x256x256xf32, #tpu.memory_space<vmem>>, vector<1x256x256xf32>
    %20 = vector.shape_cast %19 : vector<1x256x256xf32> to vector<256x256xf32>
    %cst_22 = arith.constant dense<0.000000e+00> : vector<4x256xf32>
    %21 = tpu.matmul %18, %20, %cst_22 {dimension_numbers = #tpu.dot_dimension_numbers<[1], [0], [0], [1], [0, 0, 1, 1], [], []>} : vector<4x256xf32>, vector<256x256xf32>, vector<4x256xf32> -> vector<4x256xf32>
    %c3 = arith.constant 3 : index
    %c0_23 = arith.constant 0 : index
    %c0_24 = arith.constant 0 : index
    %22 = vector.load %arg2[%c3, %c0_23, %c0_24] : memref<9x4x4xf32, #tpu.memory_space<vmem>>, vector<1x4x4xf32>
    %23 = vector.shape_cast %22 : vector<1x4x4xf32> to vector<4x4xf32>
    %cst_25 = arith.constant dense<0.000000e+00> : vector<4x256xf32>
    %24 = tpu.matmul %23, %4, %cst_25 {dimension_numbers = #tpu.dot_dimension_numbers<[1], [0], [0], [1], [0, 0, 1, 1], [], []>} : vector<4x4xf32>, vector<4x256xf32>, vector<4x256xf32> -> vector<4x256xf32>
    %c4 = arith.constant 4 : index
    %c0_26 = arith.constant 0 : index
    %c0_27 = arith.constant 0 : index
    %25 = vector.load %arg2[%c4, %c0_26, %c0_27] : memref<9x4x4xf32, #tpu.memory_space<vmem>>, vector<1x4x4xf32>
    %26 = vector.shape_cast %25 : vector<1x4x4xf32> to vector<4x4xf32>
    %cst_28 = arith.constant dense<0.000000e+00> : vector<4x256xf32>
    %27 = tpu.matmul %26, %1, %cst_28 {dimension_numbers = #tpu.dot_dimension_numbers<[1], [0], [0], [1], [0, 0, 1, 1], [], []>} : vector<4x4xf32>, vector<4x256xf32>, vector<4x256xf32> -> vector<4x256xf32>
    %28 = arith.addf %24, %27 : vector<4x256xf32>
    %c5 = arith.constant 5 : index
    %c0_29 = arith.constant 0 : index
    %c0_30 = arith.constant 0 : index
    %29 = vector.load %arg2[%c5, %c0_29, %c0_30] : memref<9x4x4xf32, #tpu.memory_space<vmem>>, vector<1x4x4xf32>
    %30 = vector.shape_cast %29 : vector<1x4x4xf32> to vector<4x4xf32>
    %cst_31 = arith.constant dense<0.000000e+00> : vector<4x256xf32>
    %31 = tpu.matmul %30, %7, %cst_31 {dimension_numbers = #tpu.dot_dimension_numbers<[1], [0], [0], [1], [0, 0, 1, 1], [], []>} : vector<4x4xf32>, vector<4x256xf32>, vector<4x256xf32> -> vector<4x256xf32>
    %32 = arith.addf %28, %31 : vector<4x256xf32>
    %33 = arith.addf %21, %32 : vector<4x256xf32>
    %c6 = arith.constant 6 : index
    %c0_32 = arith.constant 0 : index
    %c0_33 = arith.constant 0 : index
    %34 = vector.load %arg2[%c6, %c0_32, %c0_33] : memref<9x4x4xf32, #tpu.memory_space<vmem>>, vector<1x4x4xf32>
    %35 = vector.shape_cast %34 : vector<1x4x4xf32> to vector<4x4xf32>
    %cst_34 = arith.constant dense<0.000000e+00> : vector<4x256xf32>
    %36 = tpu.matmul %35, %4, %cst_34 {dimension_numbers = #tpu.dot_dimension_numbers<[1], [0], [0], [1], [0, 0, 1, 1], [], []>} : vector<4x4xf32>, vector<4x256xf32>, vector<4x256xf32> -> vector<4x256xf32>
    %c7 = arith.constant 7 : index
    %c0_35 = arith.constant 0 : index
    %c0_36 = arith.constant 0 : index
    %37 = vector.load %arg2[%c7, %c0_35, %c0_36] : memref<9x4x4xf32, #tpu.memory_space<vmem>>, vector<1x4x4xf32>
    %38 = vector.shape_cast %37 : vector<1x4x4xf32> to vector<4x4xf32>
    %cst_37 = arith.constant dense<0.000000e+00> : vector<4x256xf32>
    %39 = tpu.matmul %38, %1, %cst_37 {dimension_numbers = #tpu.dot_dimension_numbers<[1], [0], [0], [1], [0, 0, 1, 1], [], []>} : vector<4x4xf32>, vector<4x256xf32>, vector<4x256xf32> -> vector<4x256xf32>
    %40 = arith.addf %36, %39 : vector<4x256xf32>
    %c8 = arith.constant 8 : index
    %c0_38 = arith.constant 0 : index
    %c0_39 = arith.constant 0 : index
    %41 = vector.load %arg2[%c8, %c0_38, %c0_39] : memref<9x4x4xf32, #tpu.memory_space<vmem>>, vector<1x4x4xf32>
    %42 = vector.shape_cast %41 : vector<1x4x4xf32> to vector<4x4xf32>
    %cst_40 = arith.constant dense<0.000000e+00> : vector<4x256xf32>
    %43 = tpu.matmul %42, %7, %cst_40 {dimension_numbers = #tpu.dot_dimension_numbers<[1], [0], [0], [1], [0, 0, 1, 1], [], []>} : vector<4x4xf32>, vector<4x256xf32>, vector<4x256xf32> -> vector<4x256xf32>
    %44 = arith.addf %40, %43 : vector<4x256xf32>
    %c1_41 = arith.constant 1 : index
    %c0_42 = arith.constant 0 : index
    %c0_43 = arith.constant 0 : index
    %45 = vector.load %arg7[%c1_41, %c0_42, %c0_43] : memref<2x256x256xf32, #tpu.memory_space<vmem>>, vector<1x256x256xf32>
    %46 = vector.shape_cast %45 : vector<1x256x256xf32> to vector<256x256xf32>
    %cst_44 = arith.constant dense<0.000000e+00> : vector<4x256xf32>
    %47 = tpu.matmul %44, %46, %cst_44 {dimension_numbers = #tpu.dot_dimension_numbers<[1], [0], [0], [1], [0, 0, 1, 1], [], []>} : vector<4x256xf32>, vector<256x256xf32>, vector<4x256xf32> -> vector<4x256xf32>
    %48 = arith.addf %33, %47 : vector<4x256xf32>
    %c0_45 = arith.constant 0 : index
    %c0_46 = arith.constant 0 : index
    %49 = vector.load %arg3[%c0_45, %c0_46] : memref<4x1xf32, #tpu.memory_space<vmem>>, vector<4x1xf32>
    %50 = vector.broadcast %49 : vector<4x1xf32> to vector<4x256xf32>
    %51 = arith.addf %48, %50 : vector<4x256xf32>
    %cst_47 = arith.constant 0.000000e+00 : f32
    %52 = vector.broadcast %cst_47 : f32 to vector<4x256xf32>
    %53 = arith.maximumf %51, %52 : vector<4x256xf32>
    %c0_48 = arith.constant 0 : index
    %c0_49 = arith.constant 0 : index
    %c0_50 = arith.constant 0 : index
    %54 = vector.load %arg8[%c0_48, %c0_49, %c0_50] : memref<4x256x64xf32, #tpu.memory_space<vmem>>, vector<1x256x64xf32>
    %55 = vector.shape_cast %54 : vector<1x256x64xf32> to vector<256x64xf32>
    %cst_51 = arith.constant dense<0.000000e+00> : vector<4x64xf32>
    %56 = tpu.matmul %53, %55, %cst_51 {dimension_numbers = #tpu.dot_dimension_numbers<[1], [0], [0], [1], [0, 0, 1, 1], [], []>} : vector<4x256xf32>, vector<256x64xf32>, vector<4x64xf32> -> vector<4x64xf32>
    %c1_52 = arith.constant 1 : index
    %c0_53 = arith.constant 0 : index
    %c0_54 = arith.constant 0 : index
    %57 = vector.load %arg8[%c1_52, %c0_53, %c0_54] : memref<4x256x64xf32, #tpu.memory_space<vmem>>, vector<1x256x64xf32>
    %58 = vector.shape_cast %57 : vector<1x256x64xf32> to vector<256x64xf32>
    %cst_55 = arith.constant dense<0.000000e+00> : vector<4x64xf32>
    %59 = tpu.matmul %53, %58, %cst_55 {dimension_numbers = #tpu.dot_dimension_numbers<[1], [0], [0], [1], [0, 0, 1, 1], [], []>} : vector<4x256xf32>, vector<256x64xf32>, vector<4x64xf32> -> vector<4x64xf32>
    %c2_56 = arith.constant 2 : index
    %c0_57 = arith.constant 0 : index
    %c0_58 = arith.constant 0 : index
    %60 = vector.load %arg8[%c2_56, %c0_57, %c0_58] : memref<4x256x64xf32, #tpu.memory_space<vmem>>, vector<1x256x64xf32>
    %61 = vector.shape_cast %60 : vector<1x256x64xf32> to vector<256x64xf32>
    %cst_59 = arith.constant dense<0.000000e+00> : vector<4x64xf32>
    %62 = tpu.matmul %53, %61, %cst_59 {dimension_numbers = #tpu.dot_dimension_numbers<[1], [0], [0], [1], [0, 0, 1, 1], [], []>} : vector<4x256xf32>, vector<256x64xf32>, vector<4x64xf32> -> vector<4x64xf32>
    %c3_60 = arith.constant 3 : index
    %c0_61 = arith.constant 0 : index
    %c0_62 = arith.constant 0 : index
    %63 = vector.load %arg8[%c3_60, %c0_61, %c0_62] : memref<4x256x64xf32, #tpu.memory_space<vmem>>, vector<1x256x64xf32>
    %64 = vector.shape_cast %63 : vector<1x256x64xf32> to vector<256x64xf32>
    %cst_63 = arith.constant dense<0.000000e+00> : vector<4x64xf32>
    %65 = tpu.matmul %53, %64, %cst_63 {dimension_numbers = #tpu.dot_dimension_numbers<[1], [0], [0], [1], [0, 0, 1, 1], [], []>} : vector<4x256xf32>, vector<256x64xf32>, vector<4x64xf32> -> vector<4x64xf32>
    %66 = arith.maximumf %56, %59 : vector<4x64xf32>
    %67 = arith.maximumf %62, %65 : vector<4x64xf32>
    %68 = arith.maximumf %66, %67 : vector<4x64xf32>
    %c0_64 = arith.constant 0 : index
    %c0_65 = arith.constant 0 : index
    %c0_66 = arith.constant 0 : index
    %69 = vector.load %arg9[%c0_64, %c0_65, %c0_66] : memref<2x64x64xf32, #tpu.memory_space<vmem>>, vector<1x64x64xf32>
    %70 = vector.shape_cast %69 : vector<1x64x64xf32> to vector<64x64xf32>
    %cst_67 = arith.constant dense<0.000000e+00> : vector<4x64xf32>
    %71 = tpu.matmul %68, %70, %cst_67 {dimension_numbers = #tpu.dot_dimension_numbers<[1], [0], [0], [1], [0, 0, 1, 1], [], []>} : vector<4x64xf32>, vector<64x64xf32>, vector<4x64xf32> -> vector<4x64xf32>
    %c1_68 = arith.constant 1 : index
    %c0_69 = arith.constant 0 : index
    %c0_70 = arith.constant 0 : index
    %72 = vector.load %arg9[%c1_68, %c0_69, %c0_70] : memref<2x64x64xf32, #tpu.memory_space<vmem>>, vector<1x64x64xf32>
    %73 = vector.shape_cast %72 : vector<1x64x64xf32> to vector<64x64xf32>
    %cst_71 = arith.constant dense<0.000000e+00> : vector<4x64xf32>
    %74 = tpu.matmul %68, %73, %cst_71 {dimension_numbers = #tpu.dot_dimension_numbers<[1], [0], [0], [1], [0, 0, 1, 1], [], []>} : vector<4x64xf32>, vector<64x64xf32>, vector<4x64xf32> -> vector<4x64xf32>
    %c0_72 = arith.constant 0 : index
    %c0_73 = arith.constant 0 : index
    %c0_74 = arith.constant 0 : index
    %75 = vector.load %arg4[%c0_72, %c0_73, %c0_74] : memref<9x4x4xf32, #tpu.memory_space<vmem>>, vector<1x4x4xf32>
    %76 = vector.shape_cast %75 : vector<1x4x4xf32> to vector<4x4xf32>
    %cst_75 = arith.constant dense<0.000000e+00> : vector<4x64xf32>
    %77 = tpu.matmul %76, %71, %cst_75 {dimension_numbers = #tpu.dot_dimension_numbers<[1], [0], [0], [1], [0, 0, 1, 1], [], []>} : vector<4x4xf32>, vector<4x64xf32>, vector<4x64xf32> -> vector<4x64xf32>
    %c1_76 = arith.constant 1 : index
    %c0_77 = arith.constant 0 : index
    %c0_78 = arith.constant 0 : index
    %78 = vector.load %arg4[%c1_76, %c0_77, %c0_78] : memref<9x4x4xf32, #tpu.memory_space<vmem>>, vector<1x4x4xf32>
    %79 = vector.shape_cast %78 : vector<1x4x4xf32> to vector<4x4xf32>
    %cst_79 = arith.constant dense<0.000000e+00> : vector<4x64xf32>
    %80 = tpu.matmul %79, %68, %cst_79 {dimension_numbers = #tpu.dot_dimension_numbers<[1], [0], [0], [1], [0, 0, 1, 1], [], []>} : vector<4x4xf32>, vector<4x64xf32>, vector<4x64xf32> -> vector<4x64xf32>
    %81 = arith.addf %77, %80 : vector<4x64xf32>
    %c2_80 = arith.constant 2 : index
    %c0_81 = arith.constant 0 : index
    %c0_82 = arith.constant 0 : index
    %82 = vector.load %arg4[%c2_80, %c0_81, %c0_82] : memref<9x4x4xf32, #tpu.memory_space<vmem>>, vector<1x4x4xf32>
    %83 = vector.shape_cast %82 : vector<1x4x4xf32> to vector<4x4xf32>
    %cst_83 = arith.constant dense<0.000000e+00> : vector<4x64xf32>
    %84 = tpu.matmul %83, %74, %cst_83 {dimension_numbers = #tpu.dot_dimension_numbers<[1], [0], [0], [1], [0, 0, 1, 1], [], []>} : vector<4x4xf32>, vector<4x64xf32>, vector<4x64xf32> -> vector<4x64xf32>
    %85 = arith.addf %81, %84 : vector<4x64xf32>
    %c0_84 = arith.constant 0 : index
    %c0_85 = arith.constant 0 : index
    %c0_86 = arith.constant 0 : index
    %86 = vector.load %arg10[%c0_84, %c0_85, %c0_86] : memref<2x64x64xf32, #tpu.memory_space<vmem>>, vector<1x64x64xf32>
    %87 = vector.shape_cast %86 : vector<1x64x64xf32> to vector<64x64xf32>
    %cst_87 = arith.constant dense<0.000000e+00> : vector<4x64xf32>
    %88 = tpu.matmul %85, %87, %cst_87 {dimension_numbers = #tpu.dot_dimension_numbers<[1], [0], [0], [1], [0, 0, 1, 1], [], []>} : vector<4x64xf32>, vector<64x64xf32>, vector<4x64xf32> -> vector<4x64xf32>
    %c3_88 = arith.constant 3 : index
    %c0_89 = arith.constant 0 : index
    %c0_90 = arith.constant 0 : index
    %89 = vector.load %arg4[%c3_88, %c0_89, %c0_90] : memref<9x4x4xf32, #tpu.memory_space<vmem>>, vector<1x4x4xf32>
    %90 = vector.shape_cast %89 : vector<1x4x4xf32> to vector<4x4xf32>
    %cst_91 = arith.constant dense<0.000000e+00> : vector<4x64xf32>
    %91 = tpu.matmul %90, %71, %cst_91 {dimension_numbers = #tpu.dot_dimension_numbers<[1], [0], [0], [1], [0, 0, 1, 1], [], []>} : vector<4x4xf32>, vector<4x64xf32>, vector<4x64xf32> -> vector<4x64xf32>
    %c4_92 = arith.constant 4 : index
    %c0_93 = arith.constant 0 : index
    %c0_94 = arith.constant 0 : index
    %92 = vector.load %arg4[%c4_92, %c0_93, %c0_94] : memref<9x4x4xf32, #tpu.memory_space<vmem>>, vector<1x4x4xf32>
    %93 = vector.shape_cast %92 : vector<1x4x4xf32> to vector<4x4xf32>
    %cst_95 = arith.constant dense<0.000000e+00> : vector<4x64xf32>
    %94 = tpu.matmul %93, %68, %cst_95 {dimension_numbers = #tpu.dot_dimension_numbers<[1], [0], [0], [1], [0, 0, 1, 1], [], []>} : vector<4x4xf32>, vector<4x64xf32>, vector<4x64xf32> -> vector<4x64xf32>
    %95 = arith.addf %91, %94 : vector<4x64xf32>
    %c5_96 = arith.constant 5 : index
    %c0_97 = arith.constant 0 : index
    %c0_98 = arith.constant 0 : index
    %96 = vector.load %arg4[%c5_96, %c0_97, %c0_98] : memref<9x4x4xf32, #tpu.memory_space<vmem>>, vector<1x4x4xf32>
    %97 = vector.shape_cast %96 : vector<1x4x4xf32> to vector<4x4xf32>
    %cst_99 = arith.constant dense<0.000000e+00> : vector<4x64xf32>
    %98 = tpu.matmul %97, %74, %cst_99 {dimension_numbers = #tpu.dot_dimension_numbers<[1], [0], [0], [1], [0, 0, 1, 1], [], []>} : vector<4x4xf32>, vector<4x64xf32>, vector<4x64xf32> -> vector<4x64xf32>
    %99 = arith.addf %95, %98 : vector<4x64xf32>
    %100 = arith.addf %88, %99 : vector<4x64xf32>
    %c6_100 = arith.constant 6 : index
    %c0_101 = arith.constant 0 : index
    %c0_102 = arith.constant 0 : index
    %101 = vector.load %arg4[%c6_100, %c0_101, %c0_102] : memref<9x4x4xf32, #tpu.memory_space<vmem>>, vector<1x4x4xf32>
    %102 = vector.shape_cast %101 : vector<1x4x4xf32> to vector<4x4xf32>
    %cst_103 = arith.constant dense<0.000000e+00> : vector<4x64xf32>
    %103 = tpu.matmul %102, %71, %cst_103 {dimension_numbers = #tpu.dot_dimension_numbers<[1], [0], [0], [1], [0, 0, 1, 1], [], []>} : vector<4x4xf32>, vector<4x64xf32>, vector<4x64xf32> -> vector<4x64xf32>
    %c7_104 = arith.constant 7 : index
    %c0_105 = arith.constant 0 : index
    %c0_106 = arith.constant 0 : index
    %104 = vector.load %arg4[%c7_104, %c0_105, %c0_106] : memref<9x4x4xf32, #tpu.memory_space<vmem>>, vector<1x4x4xf32>
    %105 = vector.shape_cast %104 : vector<1x4x4xf32> to vector<4x4xf32>
    %cst_107 = arith.constant dense<0.000000e+00> : vector<4x64xf32>
    %106 = tpu.matmul %105, %68, %cst_107 {dimension_numbers = #tpu.dot_dimension_numbers<[1], [0], [0], [1], [0, 0, 1, 1], [], []>} : vector<4x4xf32>, vector<4x64xf32>, vector<4x64xf32> -> vector<4x64xf32>
    %107 = arith.addf %103, %106 : vector<4x64xf32>
    %c8_108 = arith.constant 8 : index
    %c0_109 = arith.constant 0 : index
    %c0_110 = arith.constant 0 : index
    %108 = vector.load %arg4[%c8_108, %c0_109, %c0_110] : memref<9x4x4xf32, #tpu.memory_space<vmem>>, vector<1x4x4xf32>
    %109 = vector.shape_cast %108 : vector<1x4x4xf32> to vector<4x4xf32>
    %cst_111 = arith.constant dense<0.000000e+00> : vector<4x64xf32>
    %110 = tpu.matmul %109, %74, %cst_111 {dimension_numbers = #tpu.dot_dimension_numbers<[1], [0], [0], [1], [0, 0, 1, 1], [], []>} : vector<4x4xf32>, vector<4x64xf32>, vector<4x64xf32> -> vector<4x64xf32>
    %111 = arith.addf %107, %110 : vector<4x64xf32>
    %c1_112 = arith.constant 1 : index
    %c0_113 = arith.constant 0 : index
    %c0_114 = arith.constant 0 : index
    %112 = vector.load %arg10[%c1_112, %c0_113, %c0_114] : memref<2x64x64xf32, #tpu.memory_space<vmem>>, vector<1x64x64xf32>
    %113 = vector.shape_cast %112 : vector<1x64x64xf32> to vector<64x64xf32>
    %cst_115 = arith.constant dense<0.000000e+00> : vector<4x64xf32>
    %114 = tpu.matmul %111, %113, %cst_115 {dimension_numbers = #tpu.dot_dimension_numbers<[1], [0], [0], [1], [0, 0, 1, 1], [], []>} : vector<4x64xf32>, vector<64x64xf32>, vector<4x64xf32> -> vector<4x64xf32>
    %115 = arith.addf %100, %114 : vector<4x64xf32>
    %c0_116 = arith.constant 0 : index
    %c0_117 = arith.constant 0 : index
    %116 = vector.load %arg5[%c0_116, %c0_117] : memref<4x1xf32, #tpu.memory_space<vmem>>, vector<4x1xf32>
    %117 = vector.broadcast %116 : vector<4x1xf32> to vector<4x64xf32>
    %118 = arith.addf %115, %117 : vector<4x64xf32>
    %cst_118 = arith.constant 0.000000e+00 : f32
    %119 = vector.broadcast %cst_118 : f32 to vector<4x64xf32>
    %120 = arith.maximumf %118, %119 : vector<4x64xf32>
    %c0_119 = arith.constant 0 : index
    %c0_120 = arith.constant 0 : index
    %c0_121 = arith.constant 0 : index
    %121 = vector.load %arg11[%c0_119, %c0_120, %c0_121] : memref<4x64x16xf32, #tpu.memory_space<vmem>>, vector<1x64x16xf32>
    %122 = vector.shape_cast %121 : vector<1x64x16xf32> to vector<64x16xf32>
    %cst_122 = arith.constant dense<0.000000e+00> : vector<4x16xf32>
    %123 = tpu.matmul %120, %122, %cst_122 {dimension_numbers = #tpu.dot_dimension_numbers<[1], [0], [0], [1], [0, 0, 1, 1], [], []>} : vector<4x64xf32>, vector<64x16xf32>, vector<4x16xf32> -> vector<4x16xf32>
    %c1_123 = arith.constant 1 : index
    %c0_124 = arith.constant 0 : index
    %c0_125 = arith.constant 0 : index
    %124 = vector.load %arg11[%c1_123, %c0_124, %c0_125] : memref<4x64x16xf32, #tpu.memory_space<vmem>>, vector<1x64x16xf32>
    %125 = vector.shape_cast %124 : vector<1x64x16xf32> to vector<64x16xf32>
    %cst_126 = arith.constant dense<0.000000e+00> : vector<4x16xf32>
    %126 = tpu.matmul %120, %125, %cst_126 {dimension_numbers = #tpu.dot_dimension_numbers<[1], [0], [0], [1], [0, 0, 1, 1], [], []>} : vector<4x64xf32>, vector<64x16xf32>, vector<4x16xf32> -> vector<4x16xf32>
    %c2_127 = arith.constant 2 : index
    %c0_128 = arith.constant 0 : index
    %c0_129 = arith.constant 0 : index
    %127 = vector.load %arg11[%c2_127, %c0_128, %c0_129] : memref<4x64x16xf32, #tpu.memory_space<vmem>>, vector<1x64x16xf32>
    %128 = vector.shape_cast %127 : vector<1x64x16xf32> to vector<64x16xf32>
    %cst_130 = arith.constant dense<0.000000e+00> : vector<4x16xf32>
    %129 = tpu.matmul %120, %128, %cst_130 {dimension_numbers = #tpu.dot_dimension_numbers<[1], [0], [0], [1], [0, 0, 1, 1], [], []>} : vector<4x64xf32>, vector<64x16xf32>, vector<4x16xf32> -> vector<4x16xf32>
    %c3_131 = arith.constant 3 : index
    %c0_132 = arith.constant 0 : index
    %c0_133 = arith.constant 0 : index
    %130 = vector.load %arg11[%c3_131, %c0_132, %c0_133] : memref<4x64x16xf32, #tpu.memory_space<vmem>>, vector<1x64x16xf32>
    %131 = vector.shape_cast %130 : vector<1x64x16xf32> to vector<64x16xf32>
    %cst_134 = arith.constant dense<0.000000e+00> : vector<4x16xf32>
    %132 = tpu.matmul %120, %131, %cst_134 {dimension_numbers = #tpu.dot_dimension_numbers<[1], [0], [0], [1], [0, 0, 1, 1], [], []>} : vector<4x64xf32>, vector<64x16xf32>, vector<4x16xf32> -> vector<4x16xf32>
    %133 = arith.maximumf %123, %126 : vector<4x16xf32>
    %134 = arith.maximumf %129, %132 : vector<4x16xf32>
    %135 = arith.maximumf %133, %134 : vector<4x16xf32>
    %c0_135 = arith.constant 0 : index
    %c0_136 = arith.constant 0 : index
    %136 = vector.load %arg13[%c0_135, %c0_136] : memref<4x4xf32, #tpu.memory_space<vmem>>, vector<4x4xf32>
    %cst_137 = arith.constant dense<0.000000e+00> : vector<4x16xf32>
    %137 = tpu.matmul %136, %135, %cst_137 {dimension_numbers = #tpu.dot_dimension_numbers<[1], [0], [0], [1], [0, 0, 1, 1], [], []>} : vector<4x4xf32>, vector<4x16xf32>, vector<4x16xf32> -> vector<4x16xf32>
    %c0_138 = arith.constant 0 : index
    %c0_139 = arith.constant 0 : index
    %138 = vector.load %arg14[%c0_138, %c0_139] : memref<4x4xf32, #tpu.memory_space<vmem>>, vector<4x4xf32>
    %cst_140 = arith.constant dense<0.000000e+00> : vector<4x16xf32>
    %139 = tpu.matmul %138, %135, %cst_140 {dimension_numbers = #tpu.dot_dimension_numbers<[1], [0], [0], [1], [0, 0, 1, 1], [], []>} : vector<4x4xf32>, vector<4x16xf32>, vector<4x16xf32> -> vector<4x16xf32>
    %c0_141 = arith.constant 0 : index
    %c0_142 = arith.constant 0 : index
    %140 = vector.load %arg12[%c0_141, %c0_142] : memref<4x4xf32, #tpu.memory_space<vmem>>, vector<4x4xf32>
    %cst_143 = arith.constant dense<0.000000e+00> : vector<4x16xf32>
    %141 = tpu.matmul %140, %137, %cst_143 {dimension_numbers = #tpu.dot_dimension_numbers<[1], [0], [0], [1], [0, 0, 1, 1], [], []>} : vector<4x4xf32>, vector<4x16xf32>, vector<4x16xf32> -> vector<4x16xf32>
    %cst_144 = arith.constant dense<0xFF800000> : vector<4xf32>
    %142 = vector.multi_reduction <maximumf>, %141, %cst_144 [1] : vector<4x16xf32> to vector<4xf32>
    %143 = vector.shape_cast %142 : vector<4xf32> to vector<4x1xf32>
    %144 = vector.broadcast %143 : vector<4x1xf32> to vector<4x16xf32>
    %145 = arith.subf %141, %144 : vector<4x16xf32>
    %146 = math.exp %145 : vector<4x16xf32>
    %cst_145 = arith.constant dense<0.000000e+00> : vector<4xf32>
    %147 = vector.multi_reduction <add>, %146, %cst_145 [1] : vector<4x16xf32> to vector<4xf32>
    %148 = vector.shape_cast %147 : vector<4xf32> to vector<4x1xf32>
    %149 = tpu.reciprocal %148 {approx = true} : vector<4x1xf32> -> vector<4x1xf32>
    %150 = vector.broadcast %149 : vector<4x1xf32> to vector<4x16xf32>
    %151 = arith.mulf %146, %150 : vector<4x16xf32>
    %cst_146 = arith.constant dense<0.000000e+00> : vector<4x4xf32>
    %152 = tpu.matmul %151, %139, %cst_146 {dimension_numbers = #tpu.dot_dimension_numbers<[1], [1], [0], [0], [0, 0, 1, 0], [], []>} : vector<4x16xf32>, vector<4x16xf32>, vector<4x4xf32> -> vector<4x4xf32>
    %c0_147 = arith.constant 0 : index
    %c0_148 = arith.constant 0 : index
    %153 = vector.load %arg15[%c0_147, %c0_148] : memref<4x4xf32, #tpu.memory_space<vmem>>, vector<4x4xf32>
    %154 = arith.mulf %152, %153 : vector<4x4xf32>
    %cst_149 = arith.constant dense<0.000000e+00> : vector<4xf32>
    %155 = vector.multi_reduction <add>, %154, %cst_149 [1] : vector<4x4xf32> to vector<4xf32>
    %156 = vector.shape_cast %155 : vector<4xf32> to vector<4x1xf32>
    %c0_150 = arith.constant 0 : index
    %c0_151 = arith.constant 0 : index
    %157 = vector.load %arg16[%c0_150, %c0_151] : memref<4x1xf32, #tpu.memory_space<vmem>>, vector<4x1xf32>
    %158 = arith.addf %156, %157 : vector<4x1xf32>
    %cst_152 = arith.constant 0.000000e+00 : f32
    %159 = vector.broadcast %cst_152 : f32 to vector<4x1xf32>
    %160 = arith.maximumf %158, %159 : vector<4x1xf32>
    %cst_153 = arith.constant 1.000000e+00 : f32
    %161 = vector.broadcast %cst_153 : f32 to vector<4x1xf32>
    %162 = arith.addf %160, %161 : vector<4x1xf32>
    %163 = vector.broadcast %162 : vector<4x1xf32> to vector<4x256xf32>
    %164 = arith.mulf %1, %163 : vector<4x256xf32>
    %c0_154 = arith.constant 0 : index
    %c0_155 = arith.constant 0 : index
    %c0_156 = arith.constant 0 : index
    %165 = vector.load %arg17[%c0_154, %c0_155, %c0_156] : memref<1x4x256xf32, #tpu.memory_space<vmem>>, vector<1x4x256xf32>
    %166 = vector.shape_cast %165 : vector<1x4x256xf32> to vector<4x256xf32>
    %167 = vector.shape_cast %164 : vector<4x256xf32> to vector<1x4x256xf32>
    tpu.vector_store %arg17[%c0_154, %c0_155, %c0_156], %167 {strides = array<i32>} : memref<1x4x256xf32, #tpu.memory_space<vmem>>, vector<1x4x256xf32>,
    return
  }
  func.func @transform_0(%arg0: i32) -> (i32, i32, i32) {
    %c0_i32 = arith.constant 0 : i32
    %c0_i32_0 = arith.constant 0 : i32
    %c0_i32_1 = arith.constant 0 : i32
    return %arg0, %c0_i32, %c0_i32_0 : i32, i32, i32
  }
  func.func @transform_1(%arg0: i32) -> (i32, i32, i32) {
    %c0_i32 = arith.constant 0 : i32
    %c0_i32_0 = arith.constant 0 : i32
    %c0_i32_1 = arith.constant 0 : i32
    %c0_i32_2 = arith.constant 0 : i32
    return %c0_i32, %c0_i32_0, %c0_i32_1 : i32, i32, i32
  }
  func.func @transform_2(%arg0: i32) -> (i32, i32) {
    %c0_i32 = arith.constant 0 : i32
    %c0_i32_0 = arith.constant 0 : i32
    %c0_i32_1 = arith.constant 0 : i32
    return %c0_i32, %c0_i32_0 : i32, i32
  }
  func.func @transform_3(%arg0: i32) -> (i32, i32, i32) {
    %c0_i32 = arith.constant 0 : i32
    %c0_i32_0 = arith.constant 0 : i32
    %c0_i32_1 = arith.constant 0 : i32
    %c0_i32_2 = arith.constant 0 : i32
    return %c0_i32, %c0_i32_0, %c0_i32_1 : i32, i32, i32
  }
  func.func @transform_4(%arg0: i32) -> (i32, i32) {
    %c0_i32 = arith.constant 0 : i32
    %c0_i32_0 = arith.constant 0 : i32
    %c0_i32_1 = arith.constant 0 : i32
    return %c0_i32, %c0_i32_0 : i32, i32
  }
  func.func @transform_5(%arg0: i32) -> (i32, i32, i32) {
    %c0_i32 = arith.constant 0 : i32
    %c0_i32_0 = arith.constant 0 : i32
    %c0_i32_1 = arith.constant 0 : i32
    %c0_i32_2 = arith.constant 0 : i32
    return %c0_i32, %c0_i32_0, %c0_i32_1 : i32, i32, i32
  }
  func.func @transform_6(%arg0: i32) -> (i32, i32, i32) {
    %c0_i32 = arith.constant 0 : i32
    %c0_i32_0 = arith.constant 0 : i32
    %c0_i32_1 = arith.constant 0 : i32
    %c0_i32_2 = arith.constant 0 : i32
    return %c0_i32, %c0_i32_0, %c0_i32_1 : i32, i32, i32
  }
  func.func @transform_7(%arg0: i32) -> (i32, i32, i32) {
    %c0_i32 = arith.constant 0 : i32
    %c0_i32_0 = arith.constant 0 : i32
    %c0_i32_1 = arith.constant 0 : i32
    %c0_i32_2 = arith.constant 0 : i32
    return %c0_i32, %c0_i32_0, %c0_i32_1 : i32, i32, i32
  }
  func.func @transform_8(%arg0: i32) -> (i32, i32, i32) {
    %c0_i32 = arith.constant 0 : i32
    %c0_i32_0 = arith.constant 0 : i32
    %c0_i32_1 = arith.constant 0 : i32
    %c0_i32_2 = arith.constant 0 : i32
    return %c0_i32, %c0_i32_0, %c0_i32_1 : i32, i32, i32
  }
  func.func @transform_9(%arg0: i32) -> (i32, i32, i32) {
    %c0_i32 = arith.constant 0 : i32
    %c0_i32_0 = arith.constant 0 : i32
    %c0_i32_1 = arith.constant 0 : i32
    %c0_i32_2 = arith.constant 0 : i32
    return %c0_i32, %c0_i32_0, %c0_i32_1 : i32, i32, i32
  }
  func.func @transform_10(%arg0: i32) -> (i32, i32, i32) {
    %c0_i32 = arith.constant 0 : i32
    %c0_i32_0 = arith.constant 0 : i32
    %c0_i32_1 = arith.constant 0 : i32
    %c0_i32_2 = arith.constant 0 : i32
    return %c0_i32, %c0_i32_0, %c0_i32_1 : i32, i32, i32
  }
  func.func @transform_11(%arg0: i32) -> (i32, i32) {
    %c0_i32 = arith.constant 0 : i32
    %c0_i32_0 = arith.constant 0 : i32
    %c0_i32_1 = arith.constant 0 : i32
    return %c0_i32, %c0_i32_0 : i32, i32
  }
  func.func @transform_12(%arg0: i32) -> (i32, i32) {
    %c0_i32 = arith.constant 0 : i32
    %c0_i32_0 = arith.constant 0 : i32
    %c0_i32_1 = arith.constant 0 : i32
    return %c0_i32, %c0_i32_0 : i32, i32
  }
  func.func @transform_13(%arg0: i32) -> (i32, i32) {
    %c0_i32 = arith.constant 0 : i32
    %c0_i32_0 = arith.constant 0 : i32
    %c0_i32_1 = arith.constant 0 : i32
    return %c0_i32, %c0_i32_0 : i32, i32
  }
  func.func @transform_14(%arg0: i32) -> (i32, i32) {
    %c0_i32 = arith.constant 0 : i32
    %c0_i32_0 = arith.constant 0 : i32
    %c0_i32_1 = arith.constant 0 : i32
    return %c0_i32, %c0_i32_0 : i32, i32
  }
  func.func @transform_15(%arg0: i32) -> (i32, i32) {
    %c0_i32 = arith.constant 0 : i32
    %c0_i32_0 = arith.constant 0 : i32
    %c0_i32_1 = arith.constant 0 : i32
    return %c0_i32, %c0_i32_0 : i32, i32
  }
  func.func @transform_16(%arg0: i32) -> (i32, i32, i32) {
    %c0_i32 = arith.constant 0 : i32
    %c0_i32_0 = arith.constant 0 : i32
    %c0_i32_1 = arith.constant 0 : i32
    return %arg0, %c0_i32, %c0_i32_0 : i32, i32, i32
  }
}

</mosaic_0001>

<bundles_post_ra>
// kernel: trans_ca_forward.1
= control target key start
LH: loop header
LB: loop body
LE: loop exit
PB: predicated region body
PF: predicated region fallthrough
CT: control target
= control target key end

     0   :  { %s5456_s0 = inlined_call_operand.vmem [shape: f32[2,4,256], index: 0, kind: input, shape index: {}]   ;;  %s5457_s1 = inlined_call_operand.vmem [shape: f32[9,4,4], index: 1, kind: input, shape index: {}]   ;;  %s5458_s2 = inlined_call_operand.vmem [shape: f32[4,1], index: 2, kind: input, shape index: {}]   ;;  %s5459_s3 = inlined_call_operand.hbm [shape: f32[9,4,4], index: 3, kind: input, shape index: {}]   ;;  %s5460_s4 = inlined_call_operand.vmem [shape: f32[4,1], index: 4, kind: input, shape index: {}]   ;;  %s5461_s5 = inlined_call_operand.hbm [shape: f32[2,256,256], index: 5, kind: input, shape index: {}]   ;;  %s5462_s6 = inlined_call_operand.hbm [shape: f32[2,256,256], index: 6, kind: input, shape index: {}]   ;;  %s5463_s7 = inlined_call_operand.hbm [shape: f32[4,256,64], index: 7, kind: input, shape index: {}]   ;;  %s5464_s8 = inlined_call_operand.hbm [shape: f32[2,64,64], index: 8, kind: input, shape index: {}]   ;;  %s5465_s9 = inlined_call_operand.vmem [shape: f32[2,64,64], index: 9, kind: input, shape index: {}]   ;;  %s5466_s10 = inlined_call_operand.hbm [shape: f32[4,64,16], index: 10, kind: input, shape index: {}]   ;;  %s5467_s11 = inlined_call_operand.vmem [shape: f32[4,4], index: 11, kind: input, shape index: {}]   ;;  %s5468_s12 = inlined_call_operand.vmem [shape: f32[4,4], index: 12, kind: input, shape index: {}]   ;;  %s5469_s13 = inlined_call_operand.vmem [shape: f32[4,4], index: 13, kind: input, shape index: {}]   ;;  %s5470_s14 = inlined_call_operand.vmem [shape: f32[4,4], index: 14, kind: input, shape index: {}]   ;;  %s5471_s15 = inlined_call_operand.vmem [shape: f32[4,1], index: 15, kind: input, shape index: {}]   ;;  %s5472_s16 = inlined_call_operand.vmem [shape: f32[2,4,256], index: 16, kind: output, shape index: {}]  }
   0x1   :  { %5479 = sst [smem:[#allocation16_spill]] %s5456_s0 }
   0x2   :  { %5480 = sst [smem:[#allocation17_spill]] %s5461_s5 }
   0x3   :  { %21 = vsyncpa [#allocation3], 0 }
   0x4   :  { %22 = vsyncpa [#allocation5], 0 }
   0x5   :  { %23 = vsyncpa [#allocation8], 0 }
   0x6   :  { %24 = vsyncpa [#allocation11], 0  ;;  %s5009_s21 = smov 0  }
   0x7 LB: > { %s4908_s22 = smov [#allocation4]   ;;  %s5015_s24 = sadd.s32 4294967295, %s4906_s21   ;;  %s4906_s21 = sphi %s5009_s21, %s30_s21  }
   0x8   : > { %s436_s23 = sshll.u32 %s4908_s22, 4  ;;  %p4086_p0 = scmp.ge.s32.totalorder %s4906_s21, 1  ;;  %s437_s23 = int_to_ptr.vmem [resolvable:$true] %s436_s23 }
   0x9   : > { %p402_p1 = scmp.lt.s32.totalorder %s4906_s21, 3  ;;  %p4684_p2 = scmp.eq.s32.totalorder %s5015_s24, 0 }
   0xa   : > { %s4909_s26 = smov [#allocation7]   ;;  %s4910_s29 = smov [#allocation2]  }
   0xb   : > { %p5020_p3 = pnand %p4086_p0, %p402_p1  ;;  %s462_s27 = sshll.u32 %s4909_s26, 4  ;;  %s5026_s27 = int_to_ptr.vmem [resolvable:$true] %s462_s27 }
   0xc   : > { %s5034_s30 = sshll.u32 %s4910_s29, 4  ;;  %s4739_s17 = scalar_lea.vmem %s437_s23, 16384  ;;  %s421_s30 = int_to_ptr.vmem [resolvable:$true] %s5034_s30 }
   0xd   : > { %p4665_p4 = pneg %p5020_p3  ;;  %p4740_p7 = scmp.ne.s32.totalorder %s437_s23, %s4739_s17 }
   0xe   : > { %p4747_p10 = scmp.lt.s32.totalorder %s437_s23, %s437_s23  ;;  %p4748_p11 = scmp.lt.s32.totalorder %s4739_s17, %s4739_s17 }
   0xf   : > { %p5030_p5 = pnand %p4684_p2, %p4665_p4 }
  0x10   : > { %p4749_p12 = por %p4748_p11, %p4747_p10 }
  0x11   : > { %p5038_p6 = pneg %p5030_p5 }
  0x13   : > { %p4742_p8 = pnand %p4740_p7, %p5038_p6 }
  0x15   : > { %p4743_p9 = pneg %p4742_p8 }
  0x17   : > { %p4750_p13 = pnand %p4749_p12, %p4743_p9 }
  0x19   : > { %4753 = shalt.err (!%p4750_p13)
}
  0x1a   : > { %s5473_s18 = smov 256   ;;  %s5474_s19 = smov 16  }
  0x1b   : > { %s5484_s5 = sld [smem:[#allocation17_spill]]  ;;  %s4765_s26 = scalar_lea.vmem %s5026_s27, 16384 }
  0x1c   : > { %p4766_p0 = scmp.ne.s32.totalorder %s5026_s27, %s4765_s26  ;;  %p4773_p7 = scmp.lt.s32.totalorder %s5026_s27, %s5026_s27 }
  0x1d   : > { %p4774_p8 = scmp.lt.s32.totalorder %s4765_s26, %s4765_s26 }
  0x1e   : > { %p4768_p1 = pnand %p4766_p0, %p5038_p6 }
  0x1f   : > { %p4775_p9 = por %p4774_p8, %p4773_p7 }
  0x20   : > { %p4769_p4 = pneg %p4768_p1 }
  0x21   : > { %4671 = dma.hbm_to_vmem [thread:$0]  (!%p5030_p5), %s5484_s5, 16384, %s437_s23, [#allocation5], %s5473_s18, %s5473_s18, %s5474_s19  }
  0x22   : > { %p4776_p10 = pnand %p4775_p9, %p4769_p4 }
  0x24   : > { %4779 = shalt.err (!%p4776_p10)
}
  0x25   : > { %s5475_s29 = smov 128   ;;  %s5477_s17 = smov 8  }
  0x26   : > { %4677 = dma.hbm_to_vmem [thread:$0]  (!%p5030_p5), %s5463_s7, 16384, %s5026_s27, [#allocation8], %s5475_s29, %s5475_s29, %s5477_s17  }
  0x27   : > { %s4791_s22 = scalar_lea.vmem %s421_s30, 576  ;;  %p4799_p0 = scmp.lt.s32.totalorder %s421_s30, %s421_s30 }
  0x28   : > { %p4792_p11 = scmp.ne.s32.totalorder %s421_s30, %s4791_s22  ;;  %p4800_p1 = scmp.lt.s32.totalorder %s4791_s22, %s4791_s22 }
  0x2a   : > { %p4794_p12 = pnand %p4792_p11, %p5038_p6  ;;  %p4801_p4 = por %p4800_p1, %p4799_p0 }
  0x2c   : > { %p4795_p13 = pneg %p4794_p12 }
  0x2e   : > { %p4802_p7 = pnand %p4801_p4, %p4795_p13 }
  0x30   : > { %4805 = shalt.err (!%p4802_p7)
}
  0x31   : > { %s4915_s26 = smov 64   ;;  %s4916_s18 = smov 4  }
  0x32   : > { %4668 = dma.hbm_to_vmem [thread:$0]  (!%p5030_p5), %s5459_s3, 576, %s421_s30, [#allocation3], %s4915_s26, %s4915_s26, %s4916_s18  }
  0x33   : > { %s4917_s27 = smov [#allocation6]   ;;  %s4918_s20 = smov [#allocation9]  }
  0x34   : > { %s449_s23 = sshll.u32 %s4917_s27, 4  ;;  %s475_s29 = sshll.u32 %s4918_s20, 4  ;;  %s450_s23 = int_to_ptr.vmem [resolvable:$true] %s449_s23  ;;  %s476_s29 = int_to_ptr.vmem [resolvable:$true] %s475_s29 }
  0x35   : > { %s4817_s17 = scalar_lea.vmem %s450_s23, 16384  ;;  %p4825_p11 = scmp.lt.s32.totalorder %s450_s23, %s450_s23 }
  0x36   : > { %p4818_p8 = scmp.ne.s32.totalorder %s450_s23, %s4817_s17  ;;  %p4826_p12 = scmp.lt.s32.totalorder %s4817_s17, %s4817_s17 }
  0x38   : > { %p4820_p9 = pnand %p4818_p8, %p5038_p6  ;;  %p4827_p13 = por %p4826_p12, %p4825_p11 }
  0x3a   : > { %p4821_p10 = pneg %p4820_p9 }
  0x3c   : > { %p4828_p0 = pnand %p4827_p13, %p4821_p10 }
  0x3e   : > { %4831 = shalt.err (!%p4828_p0)
}
  0x3f   : > { %s5485_s5 = smov 16   ;;  %s5486_s30 = smov 256  }
  0x40   : > { %4674 = dma.hbm_to_vmem [thread:$0]  (!%p5030_p5), %s5462_s6, 16384, %s450_s23, [#allocation5], %s5486_s30, %s5486_s30, %s5485_s5  }
  0x41   : > { %s4843_s22 = scalar_lea.vmem %s476_s29, 2048  ;;  %p4851_p8 = scmp.lt.s32.totalorder %s476_s29, %s476_s29 }
  0x42   : > { %p4844_p1 = scmp.ne.s32.totalorder %s476_s29, %s4843_s22  ;;  %p4852_p9 = scmp.lt.s32.totalorder %s4843_s22, %s4843_s22 }
  0x44   : > { %p4846_p4 = pnand %p4844_p1, %p5038_p6  ;;  %p4853_p11 = por %p4852_p9, %p4851_p8 }
  0x46   : > { %p4847_p7 = pneg %p4846_p4 }
  0x48   : > { %p4854_p10 = pnand %p4853_p11, %p4847_p7 }
  0x4a   : > { %4857 = shalt.err (!%p4854_p10)
}
  0x4b   : > { %s5487_s17 = smov 8   ;;  %s5488_s26 = smov 128  }
  0x4c   : > { %4680 = dma.hbm_to_vmem [thread:$0]  (!%p5030_p5), %s5464_s8, 2048, %s476_s29, [#allocation8], %s5488_s26, %s5488_s26, %s5487_s17  }
  0x4d   : > { %s4919_s23 = smov [#allocation10]  }
  0x4e   : > { %s491_s5 = sshll.u32 %s4919_s23, 4  ;;  %s492_s5 = int_to_ptr.vmem [resolvable:$true] %s491_s5 }
  0x4f   : > { %s4869_s30 = scalar_lea.vmem %s492_s5, 4096  ;;  %p4877_p1 = scmp.lt.s32.totalorder %s492_s5, %s492_s5 }
  0x50   : > { %p4870_p12 = scmp.ne.s32.totalorder %s492_s5, %s4869_s30  ;;  %p4878_p4 = scmp.lt.s32.totalorder %s4869_s30, %s4869_s30 }
  0x52   : > { %p4872_p13 = pnand %p4870_p12, %p5038_p6  ;;  %p4879_p7 = por %p4878_p4, %p4877_p1 }
  0x54   : > { %p4873_p0 = pneg %p4872_p13 }
  0x56   : > { %p4880_p8 = pnand %p4879_p7, %p4873_p0 }
  0x58   : > { %4883 = shalt.err (!%p4880_p8)
}
  0x59   : > { %4683 = dma.hbm_to_vmem [thread:$0]  (!%p5030_p5), %s5466_s10, 4096, %s492_s5, [#allocation11], %s5488_s26, %s5488_s26, %s5487_s17  }
  0x5a   : > { %530 = sbr.rel (%p5020_p3) target bundleno = 3015 (0xbc7), region = 84 }
  0x5f   : > { %4889 = dma.done.wait (%p4684_p2), [#allocation3], 576  }
  0x60   : > { %4891 = vsyncadd (%p4684_p2), [#allocation3], 4294966720 }
  0x61   : > { %4893 = dma.done.wait (%p4684_p2), [#allocation5], 32768  }
  0x62   : > { %4895 = vsyncadd (%p4684_p2), [#allocation5], 4294934528 }
  0x63   : > { %4897 = dma.done.wait (%p4684_p2), [#allocation8], 18432  }
  0x64   : > { %4899 = vsyncadd (%p4684_p2), [#allocation8], 4294948864 }
  0x65   : > { %4901 = dma.done.wait (%p4684_p2), [#allocation11], 4096  }
  0x66   : > { %4903 = vsyncadd (%p4684_p2), [#allocation11], 4294963200  ;;  %v642_v0 = vld [vmem:[#allocation4 + $0xf8] sm:$0xff]  ;;  %v641_v2 = vld [vmem:[#allocation4 + $0xf0] sm:$0xff]  ;;  %p600_p2 = scmp.lt.s32.totalorder %s5015_s24, 1  ;;  %s5489_s19 = sld [smem:[#allocation16_spill]] }
  0x67   : > { %v781_v1 = vld [vmem:[#allocation4 + $0x2f8] sm:$0xff]  ;;  %678 = vmatprep.subr.mxu0 %v642_v0  ;;  %v780_v3 = vld [vmem:[#allocation4 + $0x2f0] sm:$0xff]  ;;  %v640_v4 = vld [vmem:[#allocation4 + $0xe8] sm:$0xff]  ;;  %vm892_vm0 = vcmask 1043456   ;;  %vm888_vm1 = vcmask 31744   ;;  %vm4922_vm2 = vmmov 0  }
  0x68   : > { %814 = vmatprep.subr.mxu1 %v781_v1  ;;  %v779_v5 = vld [vmem:[#allocation4 + $0x2e8] sm:$0xff]  ;;  %679 = vmatpush1.msra.mxu0 %v641_v2  ;;  %v639_v6 = vld [vmem:[#allocation4 + $0xe0] sm:$0xff]  ;;  %v638_v8 = vld [vmem:[#allocation4 + $0xd8] sm:$0xff]  ;;  %s5491_s24 = smov (!%p600_p2, %s5015_s24), 1  ;;  %vm2297_vm3 = vcmask 523264   ;;  %vm3868_vm4 = vcmask 130048  }
  0x69   : > { %815 = vmatpush1.msra.mxu1 %v780_v3  ;;  %v778_v7 = vld [vmem:[#allocation4 + $0x2e0] sm:$0xff]  ;;  %680 = vmatprep.subr.mxu0 %v640_v4  ;;  %v777_v9 = vld [vmem:[#allocation4 + $0x2d8] sm:$0xff]  ;;  %v637_v10 = vld [vmem:[#allocation4 + $0xd0] sm:$0xff]  ;;  %s4184_s25 = sshll.u32 %s5491_s24, 3  ;;  %vm3856_vm5 = vcmask 125952   ;;  %vm3947_vm6 = vcmask 27648  }
  0x6a   : > { %816 = vmatprep.subr.mxu1 %v779_v5  ;;  %v776_v11 = vld [vmem:[#allocation4 + $0x2d0] sm:$0xff]  ;;  %681 = vmatpush1.msra.mxu0 %v639_v6  ;;  %v636_v12 = vld [vmem:[#allocation4 + $0xc8] sm:$0xff]  ;;  %v635_v14 = vld [vmem:[#allocation4 + $0xc0] sm:$0xff]  ;;  %s609_s30 = scalar_lea.vmem %s5472_s16, %s4184_s25 }
  0x6b   : > { %817 = vmatpush1.msra.mxu1 %v778_v7  ;;  %v775_v13 = vld [vmem:[#allocation4 + $0x2c8] sm:$0xff]  ;;  %682 = vmatprep.subr.mxu0 %v638_v8  ;;  %v774_v15 = vld [vmem:[#allocation4 + $0x2c0] sm:$0xff]  ;;  %v634_v16 = vld [vmem:[#allocation4 + $0xb8] sm:$0xff] }
  0x6c   : > { %818 = vmatprep.subr.mxu1 %v777_v9  ;;  %683 = vmatpush1.msra.mxu0 %v637_v10  ;;  %v773_v17 = vld [vmem:[#allocation4 + $0x2b8] sm:$0xff]  ;;  %v633_v18 = vld [vmem:[#allocation4 + $0xb0] sm:$0xff]  ;;  %v632_v20 = vld [vmem:[#allocation4 + $0xa8] sm:$0xff]  ;;  %s5135_s22 = scalar_lea.vmem %s5489_s19, %s4184_s25 }
  0x6d   : > { %819 = vmatpush1.msra.mxu1 %v776_v11  ;;  %684 = vmatprep.subr.mxu0 %v636_v12  ;;  %v772_v19 = vld [vmem:[#allocation4 + $0x2b0] sm:$0xff]  ;;  %v771_v21 = vld [vmem:[#allocation4 + $0x2a8] sm:$0xff]  ;;  %v631_v22 = vld [vmem:[#allocation4 + $0xa0] sm:$0xff] }
  0x6e   : > { %820 = vmatprep.subr.mxu1 %v775_v13  ;;  %685 = vmatpush1.msra.mxu0 %v635_v14  ;;  %v770_v23 = vld [vmem:[#allocation4 + $0x2a0] sm:$0xff]  ;;  %v630_v24 = vld [vmem:[#allocation4 + $0x98] sm:$0xff]  ;;  %v629_v26 = vld [vmem:[#allocation4 + $0x90] sm:$0xff] }
  0x6f   : > { %821 = vmatpush1.msra.mxu1 %v774_v15  ;;  %686 = vmatprep.subr.mxu0 %v634_v16  ;;  %v769_v25 = vld [vmem:[#allocation4 + $0x298] sm:$0xff]  ;;  %v768_v27 = vld [vmem:[#allocation4 + $0x290] sm:$0xff]  ;;  %v628_v28 = vld [vmem:[#allocation4 + $0x88] sm:$0xff] }
  0x70   : > { %822 = vmatprep.subr.mxu1 %v773_v17  ;;  %687 = vmatpush1.msra.mxu0 %v633_v18  ;;  %v767_v29 = vld [vmem:[#allocation4 + $0x288] sm:$0xff]  ;;  %v627_v30 = vld [vmem:[#allocation4 + $0x80] sm:$0xff]  ;;  %v626_v32 = vld [vmem:[#allocation4 + $0x78] sm:$0xff] }
  0x71   : > { %823 = vmatpush1.msra.mxu1 %v772_v19  ;;  %688 = vmatprep.subr.mxu0 %v632_v20  ;;  %v766_v31 = vld [vmem:[#allocation4 + $0x280] sm:$0xff]  ;;  %v765_v33 = vld [vmem:[#allocation4 + $0x278] sm:$0xff]  ;;  %v625_v34 = vld [vmem:[#allocation4 + $0x70] sm:$0xff] }
  0x72   : > { %824 = vmatprep.subr.mxu1 %v771_v21  ;;  %689 = vmatpush1.msra.mxu0 %v631_v22  ;;  %v764_v35 = vld [vmem:[#allocation4 + $0x270] sm:$0xff]  ;;  %v624_v36 = vld [vmem:[#allocation4 + $0x68] sm:$0xff]  ;;  %v623_v38 = vld [vmem:[#allocation4 + $0x60] sm:$0xff] }
  0x73   : > { %825 = vmatpush1.msra.mxu1 %v770_v23  ;;  %690 = vmatprep.subr.mxu0 %v630_v24  ;;  %v763_v37 = vld [vmem:[#allocation4 + $0x268] sm:$0xff]  ;;  %v762_v39 = vld [vmem:[#allocation4 + $0x260] sm:$0xff]  ;;  %v622_v40 = vld [vmem:[#allocation4 + $0x58] sm:$0xff] }
  0x74   : > { %826 = vmatprep.subr.mxu1 %v769_v25  ;;  %691 = vmatpush1.msra.mxu0 %v629_v26  ;;  %v761_v41 = vld [vmem:[#allocation4 + $0x258] sm:$0xff]  ;;  %v621_v42 = vld [vmem:[#allocation4 + $0x50] sm:$0xff]  ;;  %v620_v44 = vld [vmem:[#allocation4 + $0x48] sm:$0xff] }
  0x75   : > { %827 = vmatpush1.msra.mxu1 %v768_v27  ;;  %692 = vmatprep.subr.mxu0 %v628_v28  ;;  %v760_v43 = vld [vmem:[#allocation4 + $0x250] sm:$0xff]  ;;  %v759_v45 = vld [vmem:[#allocation4 + $0x248] sm:$0xff]  ;;  %v619_v46 = vld [vmem:[#allocation4 + $0x40] sm:$0xff] }
  0x76   : > { %828 = vmatprep.subr.mxu1 %v767_v29  ;;  %693 = vmatpush1.msra.mxu0 %v627_v30  ;;  %v758_v47 = vld [vmem:[#allocation4 + $0x240] sm:$0xff]  ;;  %v618_v48 = vld [vmem:[#allocation4 + $0x38] sm:$0xff]  ;;  %v617_v50 = vld [vmem:[#allocation4 + $0x30] sm:$0xff] }
  0x77   : > { %829 = vmatpush1.msra.mxu1 %v766_v31  ;;  %694 = vmatprep.subr.mxu0 %v626_v32  ;;  %v757_v49 = vld [vmem:[#allocation4 + $0x238] sm:$0xff]  ;;  %v756_v51 = vld [vmem:[#allocation4 + $0x230] sm:$0xff]  ;;  %v616_v52 = vld [vmem:[#allocation4 + $0x28] sm:$0xff] }
  0x78   : > { %830 = vmatprep.subr.mxu1 %v765_v33  ;;  %695 = vmatpush1.msra.mxu0 %v625_v34  ;;  %v755_v53 = vld [vmem:[#allocation4 + $0x228] sm:$0xff]  ;;  %v615_v54 = vld [vmem:[#allocation4 + $0x20] sm:$0xff]  ;;  %v614_v56 = vld [vmem:[#allocation4 + $0x18] sm:$0xff] }
  0x79   : > { %831 = vmatpush1.msra.mxu1 %v764_v35  ;;  %696 = vmatprep.subr.mxu0 %v624_v36  ;;  %v754_v55 = vld [vmem:[#allocation4 + $0x220] sm:$0xff]  ;;  %v753_v57 = vld [vmem:[#allocation4 + $0x218] sm:$0xff]  ;;  %v613_v58 = vld [vmem:[#allocation4 + $0x10] sm:$0xff] }
  0x7a   : > { %832 = vmatprep.subr.mxu1 %v763_v37  ;;  %697 = vmatpush1.msra.mxu0 %v623_v38  ;;  %v752_v59 = vld [vmem:[#allocation4 + $0x210] sm:$0xff]  ;;  %v612_v60 = vld [vmem:[#allocation4 + $0x8] sm:$0xff]  ;;  %v611_v62 = vld [vmem:[#allocation4] sm:$0xff] }
  0x7b   : > { %833 = vmatpush1.msra.mxu1 %v762_v39  ;;  %698 = vmatprep.subr.mxu0 %v622_v40  ;;  %v751_v61 = vld [vmem:[#allocation4 + $0x208] sm:$0xff]  ;;  %v750_v63 = vld [vmem:[#allocation4 + $0x200] sm:$0xff]  ;;  %v674_v0 = vld [vmem:[#allocation4 + $0x1f8] sm:$0xff] }
  0x7c   : > { %834 = vmatprep.subr.mxu1 %v761_v41  ;;  %699 = vmatpush1.msra.mxu0 %v621_v42  ;;  %v813_v1 = vld [vmem:[#allocation4 + $0x3f8] sm:$0xff]  ;;  %v673_v2 = vld [vmem:[#allocation4 + $0x1f0] sm:$0xff]  ;;  %v672_v4 = vld [vmem:[#allocation4 + $0x1e8] sm:$0xff] }
  0x7d   : > { %835 = vmatpush1.msra.mxu1 %v760_v43  ;;  %700 = vmatprep.subr.mxu0 %v620_v44  ;;  %v812_v3 = vld [vmem:[#allocation4 + $0x3f0] sm:$0xff]  ;;  %v811_v5 = vld [vmem:[#allocation4 + $0x3e8] sm:$0xff]  ;;  %v671_v6 = vld [vmem:[#allocation4 + $0x1e0] sm:$0xff] }
  0x7e   : > { %836 = vmatprep.subr.mxu1 %v759_v45  ;;  %701 = vmatpush1.msra.mxu0 %v619_v46  ;;  %v810_v7 = vld [vmem:[#allocation4 + $0x3e0] sm:$0xff]  ;;  %v670_v8 = vld [vmem:[#allocation4 + $0x1d8] sm:$0xff]  ;;  %v669_v10 = vld [vmem:[#allocation4 + $0x1d0] sm:$0xff] }
  0x7f   : > { %837 = vmatpush1.msra.mxu1 %v758_v47  ;;  %702 = vmatprep.subr.mxu0 %v618_v48  ;;  %v809_v9 = vld [vmem:[#allocation4 + $0x3d8] sm:$0xff]  ;;  %v808_v11 = vld [vmem:[#allocation4 + $0x3d0] sm:$0xff]  ;;  %v668_v12 = vld [vmem:[#allocation4 + $0x1c8] sm:$0xff] }
  0x80   : > { %838 = vmatprep.subr.mxu1 %v757_v49  ;;  %703 = vmatpush1.msra.mxu0 %v617_v50  ;;  %v807_v13 = vld [vmem:[#allocation4 + $0x3c8] sm:$0xff]  ;;  %v667_v14 = vld [vmem:[#allocation4 + $0x1c0] sm:$0xff]  ;;  %v666_v16 = vld [vmem:[#allocation4 + $0x1b8] sm:$0xff] }
  0x81   : > { %839 = vmatpush1.msra.mxu1 %v756_v51  ;;  %704 = vmatprep.subr.mxu0 %v616_v52  ;;  %v806_v15 = vld [vmem:[#allocation4 + $0x3c0] sm:$0xff]  ;;  %v805_v17 = vld [vmem:[#allocation4 + $0x3b8] sm:$0xff]  ;;  %v665_v18 = vld [vmem:[#allocation4 + $0x1b0] sm:$0xff] }
  0x82   : > { %840 = vmatprep.subr.mxu1 %v755_v53  ;;  %705 = vmatpush1.msra.mxu0 %v615_v54  ;;  %v804_v19 = vld [vmem:[#allocation4 + $0x3b0] sm:$0xff]  ;;  %v664_v20 = vld [vmem:[#allocation4 + $0x1a8] sm:$0xff]  ;;  %v663_v22 = vld [vmem:[#allocation4 + $0x1a0] sm:$0xff] }
  0x83   : > { %841 = vmatpush1.msra.mxu1 %v754_v55  ;;  %706 = vmatprep.subr.mxu0 %v614_v56  ;;  %v803_v21 = vld [vmem:[#allocation4 + $0x3a8] sm:$0xff]  ;;  %v802_v23 = vld [vmem:[#allocation4 + $0x3a0] sm:$0xff]  ;;  %v662_v24 = vld [vmem:[#allocation4 + $0x198] sm:$0xff] }
  0x84   : > { %842 = vmatprep.subr.mxu1 %v753_v57  ;;  %707 = vmatpush1.msra.mxu0 %v613_v58  ;;  %v801_v25 = vld [vmem:[#allocation4 + $0x398] sm:$0xff]  ;;  %v661_v26 = vld [vmem:[#allocation4 + $0x190] sm:$0xff]  ;;  %v660_v28 = vld [vmem:[#allocation4 + $0x188] sm:$0xff] }
  0x85   : > { %843 = vmatpush1.msra.mxu1 %v752_v59  ;;  %708 = vmatprep.subr.mxu0 %v612_v60  ;;  %v800_v27 = vld [vmem:[#allocation4 + $0x390] sm:$0xff]  ;;  %v799_v29 = vld [vmem:[#allocation4 + $0x388] sm:$0xff]  ;;  %v659_v30 = vld [vmem:[#allocation4 + $0x180] sm:$0xff] }
  0x86   : > { %844 = vmatprep.subr.mxu1 %v751_v61  ;;  %709 = vmatpush1.msra.mxu0 %v611_v62  ;;  %v798_v31 = vld [vmem:[#allocation4 + $0x380] sm:$0xff]  ;;  %v658_v32 = vld [vmem:[#allocation4 + $0x178] sm:$0xff]  ;;  %v657_v34 = vld [vmem:[#allocation4 + $0x170] sm:$0xff] }
  0x87   : > { %845 = vmatpush1.msra.mxu1 %v750_v63  ;;  %710 = vmatprep.subr.mxu0 %v674_v0  ;;  %v797_v33 = vld [vmem:[#allocation4 + $0x378] sm:$0xff]  ;;  %v796_v35 = vld [vmem:[#allocation4 + $0x370] sm:$0xff]  ;;  %v656_v36 = vld [vmem:[#allocation4 + $0x168] sm:$0xff] }
  0x88   : > { %846 = vmatprep.subr.mxu1 %v813_v1  ;;  %711 = vmatpush2.msra.mxu0 %v673_v2  ;;  %v795_v37 = vld [vmem:[#allocation4 + $0x368] sm:$0xff]  ;;  %v655_v38 = vld [vmem:[#allocation4 + $0x160] sm:$0xff]  ;;  %v654_v40 = vld [vmem:[#allocation4 + $0x158] sm:$0xff]  ;;  %v4920_v2 = vmov 0.0  }
  0x89   : > { %847 = vmatpush2.msra.mxu1 %v812_v3  ;;  %712 = vmatprep.subr.mxu0 %v672_v4  ;;  %v794_v39 = vld [vmem:[#allocation4 + $0x360] sm:$0xff]  ;;  %v793_v41 = vld [vmem:[#allocation4 + $0x358] sm:$0xff]  ;;  %v653_v42 = vld [vmem:[#allocation4 + $0x150] sm:$0xff] }
  0x8a   : > { %848 = vmatprep.subr.mxu1 %v811_v5  ;;  %713 = vmatpush2.msra.mxu0 %v671_v6  ;;  %v792_v43 = vld [vmem:[#allocation4 + $0x350] sm:$0xff]  ;;  %v652_v44 = vld [vmem:[#allocation4 + $0x148] sm:$0xff]  ;;  %v651_v46 = vld [vmem:[#allocation4 + $0x140] sm:$0xff] }
  0x8b   : > { %849 = vmatpush2.msra.mxu1 %v810_v7  ;;  %714 = vmatprep.subr.mxu0 %v670_v8  ;;  %v791_v45 = vld [vmem:[#allocation4 + $0x348] sm:$0xff]  ;;  %v790_v47 = vld [vmem:[#allocation4 + $0x340] sm:$0xff]  ;;  %v650_v48 = vld [vmem:[#allocation4 + $0x138] sm:$0xff] }
  0x8c   : > { %850 = vmatprep.subr.mxu1 %v809_v9  ;;  %715 = vmatpush2.msra.mxu0 %v669_v10  ;;  %v789_v49 = vld [vmem:[#allocation4 + $0x338] sm:$0xff]  ;;  %v649_v50 = vld [vmem:[#allocation4 + $0x130] sm:$0xff]  ;;  %v648_v52 = vld [vmem:[#allocation4 + $0x128] sm:$0xff] }
  0x8d   : > { %851 = vmatpush2.msra.mxu1 %v808_v11  ;;  %716 = vmatprep.subr.mxu0 %v668_v12  ;;  %v788_v51 = vld [vmem:[#allocation4 + $0x330] sm:$0xff]  ;;  %v787_v53 = vld [vmem:[#allocation4 + $0x328] sm:$0xff]  ;;  %v647_v54 = vld [vmem:[#allocation4 + $0x120] sm:$0xff] }
  0x8e   : > { %852 = vmatprep.subr.mxu1 %v807_v13  ;;  %717 = vmatpush2.msra.mxu0 %v667_v14  ;;  %v786_v55 = vld [vmem:[#allocation4 + $0x320] sm:$0xff]  ;;  %v646_v57 = vld [vmem:[#allocation4 + $0x118] sm:$0xff]  ;;  %v645_v59 = vld [vmem:[#allocation4 + $0x110] sm:$0xff] }
  0x8f   : > { %853 = vmatpush2.msra.mxu1 %v806_v15  ;;  %718 = vmatprep.subr.mxu0 %v666_v16  ;;  %v5138_v56 = vld [vmem:[%s5135_s22] sm:$0xff]  ;;  %v784_v60 = vld [vmem:[#allocation4 + $0x310] sm:$0xff]  ;;  %v644_v61 = vld [vmem:[#allocation4 + $0x108] sm:$0xff] }
  0x90   : > { %854 = vmatprep.subr.mxu1 %v805_v17  ;;  %719 = vmatpush2.msra.mxu0 %v665_v18  ;;  %v785_v58 = vld [vmem:[#allocation4 + $0x318] sm:$0xff]  ;;  %v783_v62 = vld [vmem:[#allocation4 + $0x308] sm:$0xff]  ;;  %v676_v63 = vcombine.high %v5138_v56, %v5138_v56  ;;  %v643_v0 = vld [vmem:[#allocation4 + $0x100] sm:$0xff] }
  0x91   : > { %855 = vmatpush2.msra.mxu1 %v804_v19  ;;  %720 = vmatprep.subr.mxu0 %v664_v20  ;;  %v782_v1 = vld [vmem:[#allocation4 + $0x300] sm:$0xff]  ;;  %v885_v8 = vld [vmem:[%s5457_s1] sm:$0xf]  ;;  %v4117_v10 = vld [vmem:[%s5457_s1 + $0x10] sm:$0xf] }
  0x92   : > { %856 = vmatprep.subr.mxu1 %v803_v21  ;;  %721 = vmatpush2.msra.mxu0 %v663_v22  ;;  %v4105_v3 = vld [vmem:[%s5457_s1 + $0x4] sm:$0xf]  ;;  %v4112_v9 = vld [vmem:[%s5457_s1 + $0x8] sm:$0xf]  ;;  %v4116_v11 = vld [vmem:[%s5457_s1 + $0xc] sm:$0xf] }
  0x93   : > { %857 = vmatpush2.msra.mxu1 %v802_v23  ;;  %722 = vmatprep.subr.mxu0 %v662_v24  ;;  %v1163_v12 = vld [vmem:[#allocation6 + $0xf8] sm:$0xff]  ;;  %v4124_v13 = vld [vmem:[%s5457_s1 + $0x14] sm:$0xf]  ;;  %v1161_v15 = vld [vmem:[#allocation6 + $0xe8] sm:$0xff] }
  0x94   : > { %858 = vmatprep.subr.mxu1 %v801_v25  ;;  %723 = vmatpush2.msra.mxu0 %v661_v26  ;;  %v1162_v14 = vld [vmem:[#allocation6 + $0xf0] sm:$0xff]  ;;  %v1160_v16 = vld [vmem:[#allocation6 + $0xe0] sm:$0xff]  ;;  %v4129_v17 = vld [vmem:[%s5457_s1 + $0x1c] sm:$0xf] }
  0x95   : > { %859 = vmatpush2.msra.mxu1 %v800_v27  ;;  %724 = vmatprep.subr.mxu0 %v660_v28  ;;  %v1159_v18 = vld [vmem:[#allocation6 + $0xd8] sm:$0xff]  ;;  %v1158_v19 = vld [vmem:[#allocation6 + $0xd0] sm:$0xff]  ;;  %v1157_v20 = vld [vmem:[#allocation6 + $0xc8] sm:$0xff] }
  0x96   : > { %860 = vmatprep.subr.mxu1 %v799_v29  ;;  %725 = vmatpush2.msra.mxu0 %v659_v30  ;;  %v4128_v21 = vld [vmem:[%s5457_s1 + $0x18] sm:$0xf]  ;;  %v1156_v22 = vld [vmem:[#allocation6 + $0xc0] sm:$0xff]  ;;  %v1155_v23 = vld [vmem:[#allocation6 + $0xb8] sm:$0xff] }
  0x97   : > { %861 = vmatpush2.msra.mxu1 %v798_v31  ;;  %726 = vmatprep.subr.mxu0 %v658_v32  ;;  %v1759_v24 = vld [vmem:[#allocation6 + $0x2f8] sm:$0xff]  ;;  %v1154_v25 = vld [vmem:[#allocation6 + $0xb0] sm:$0xff]  ;;  %v1153_v27 = vld [vmem:[#allocation6 + $0xa8] sm:$0xff] }
  0x98   : > { %862 = vmatprep.subr.mxu1 %v797_v33  ;;  %727 = vmatpush2.msra.mxu0 %v657_v34  ;;  %v4136_v26 = vld [vmem:[%s5457_s1 + $0x20] sm:$0xf]  ;;  %v1152_v28 = vld [vmem:[#allocation6 + $0xa0] sm:$0xff]  ;;  %v1758_v29 = vld [vmem:[#allocation6 + $0x2f0] sm:$0xff] }
  0x99   : > { %863 = vmatpush2.msra.mxu1 %v796_v35  ;;  %728 = vmatprep.subr.mxu0 %v656_v36  ;;  %v1151_v30 = vld [vmem:[#allocation6 + $0x98] sm:$0xff]  ;;  %v1757_v31 = vld [vmem:[#allocation6 + $0x2e8] sm:$0xff]  ;;  %v1150_v32 = vld [vmem:[#allocation6 + $0x90] sm:$0xff] }
  0x9a   : > { %864 = vmatprep.subr.mxu1 %v795_v37  ;;  %729 = vmatpush2.msra.mxu0 %v655_v38  ;;  %v1756_v33 = vld [vmem:[#allocation6 + $0x2e0] sm:$0xff]  ;;  %v1149_v34 = vld [vmem:[#allocation6 + $0x88] sm:$0xff]  ;;  %v1755_v35 = vld [vmem:[#allocation6 + $0x2d8] sm:$0xff] }
  0x9b   : > { %865 = vmatpush2.msra.mxu1 %v794_v39  ;;  %730 = vmatprep.subr.mxu0 %v654_v40  ;;  %v1148_v36 = vld [vmem:[#allocation6 + $0x80] sm:$0xff]  ;;  %v1754_v37 = vld [vmem:[#allocation6 + $0x2d0] sm:$0xff]  ;;  %v1147_v38 = vld [vmem:[#allocation6 + $0x78] sm:$0xff] }
  0x9c   : > { %866 = vmatprep.subr.mxu1 %v793_v41  ;;  %731 = vmatpush2.msra.mxu0 %v653_v42  ;;  %v1753_v39 = vld [vmem:[#allocation6 + $0x2c8] sm:$0xff]  ;;  %v1146_v40 = vld [vmem:[#allocation6 + $0x70] sm:$0xff]  ;;  %v1752_v41 = vld [vmem:[#allocation6 + $0x2c0] sm:$0xff] }
  0x9d   : > { %867 = vmatpush2.msra.mxu1 %v792_v43  ;;  %732 = vmatprep.subr.mxu0 %v652_v44  ;;  %v1145_v42 = vld [vmem:[#allocation6 + $0x68] sm:$0xff]  ;;  %v1751_v43 = vld [vmem:[#allocation6 + $0x2b8] sm:$0xff]  ;;  %v1144_v44 = vld [vmem:[#allocation6 + $0x60] sm:$0xff] }
  0x9e   : > { %868 = vmatprep.subr.mxu1 %v791_v45  ;;  %733 = vmatpush2.msra.mxu0 %v651_v46  ;;  %v1750_v45 = vld [vmem:[#allocation6 + $0x2b0] sm:$0xff]  ;;  %v1143_v46 = vld [vmem:[#allocation6 + $0x58] sm:$0xff] }
  0x9f   : > { %869 = vmatpush2.msra.mxu1 %v790_v47  ;;  %734 = vmatprep.subr.mxu0 %v650_v48  ;;  %v1749_v47 = vld [vmem:[#allocation6 + $0x2a8] sm:$0xff]  ;;  %v1142_v48 = vld [vmem:[#allocation6 + $0x50] sm:$0xff] }
  0xa0   : > { %870 = vmatprep.subr.mxu1 %v789_v49  ;;  %735 = vmatpush2.msra.mxu0 %v649_v50  ;;  %v1748_v49 = vld [vmem:[#allocation6 + $0x2a0] sm:$0xff]  ;;  %v1141_v50 = vld [vmem:[#allocation6 + $0x48] sm:$0xff] }
  0xa1   : > { %871 = vmatpush2.msra.mxu1 %v788_v51  ;;  %736 = vmatprep.subr.mxu0 %v648_v52  ;;  %v1747_v51 = vld [vmem:[#allocation6 + $0x298] sm:$0xff]  ;;  %v1140_v52 = vld [vmem:[#allocation6 + $0x40] sm:$0xff] }
  0xa2   : > { %872 = vmatprep.subr.mxu1 %v787_v53  ;;  %737 = vmatpush2.msra.mxu0 %v647_v54  ;;  %v1746_v53 = vld [vmem:[#allocation6 + $0x290] sm:$0xff]  ;;  %v1139_v54 = vld [vmem:[#allocation6 + $0x38] sm:$0xff] }
  0xa3   : > { %873 = vmatpush2.msra.mxu1 %v786_v55  ;;  %738 = vmatprep.subr.mxu0 %v646_v57  ;;  %v1745_v55 = vld [vmem:[#allocation6 + $0x288] sm:$0xff]  ;;  %v1744_v57 = vld [vmem:[#allocation6 + $0x280] sm:$0xff] }
  0xa4   : > { %874 = vmatprep.subr.mxu1 %v785_v58  ;;  %739 = vmatpush2.msra.mxu0 %v645_v59  ;;  %v1137_v58 = vld [vmem:[#allocation6 + $0x28] sm:$0xff]  ;;  %v1743_v59 = vld [vmem:[#allocation6 + $0x278] sm:$0xff] }
  0xa5   : > { %875 = vmatpush2.msra.mxu1 %v784_v60  ;;  %740 = vmatprep.subr.mxu0 %v644_v61  ;;  %v1136_v60 = vld [vmem:[#allocation6 + $0x20] sm:$0xff]  ;;  %v1742_v61 = vld [vmem:[#allocation6 + $0x270] sm:$0xff] }
  0xa6   : > { %876 = vmatprep.subr.mxu1 %v783_v62  ;;  %741 = vmatpush2.msra.mxu0 %v643_v0  ;;  %v1135_v62 = vld [vmem:[#allocation6 + $0x18] sm:$0xff]  ;;  %v1134_v0 = vld [vmem:[#allocation6 + $0x10] sm:$0xff] }
  0xa7   : > { %742 = vmatprep.mubr.f32.mxu0 %v676_v63  ;;  %877 = vmatpush2.msra.mxu1 %v782_v1  ;;  %v1740_v1 = vld [vmem:[#allocation6 + $0x260] sm:$0xff] }
  0xa8   : > { %878 = vmatprep.mubr.f32.mxu1 %v676_v63  ;;  %743 = vmatmul.mubr.f32.vlgmr.msra.gmra.mxu0 %v5138_v56 }
  0xa9   : > { %879 = vmatmul.mubr.f32.vlgmr.msra.gmra.mxu1 %v5138_v56  ;;  %4106 = vmatprep.subr.msk.mxu0 %vm892_vm0, %v676_v63 }
  0xaa   : > { %4107 = vmatpush1.msk.msra.mxu0 %vm892_vm0, %v5138_v56  ;;  %961 = vmatprep.mubr.f32.mxu0 %v4920_v2 }
  0xab   : > { %1041 = vmatprep.mubr.f32.mxu1 %v4920_v2 }
  0xac   : > { %4108 = vmatmul.mubr.msk.f32.vlgmr.msra.gmra.mxu0 %vm888_vm1, %v4105_v3  ;;  %v1133_v3 = vld [vmem:[#allocation6 + $0x8] sm:$0xff] }
  0xad   : > { %1123 = vmatprep.mubr.f32.mxu0 %v4920_v2 }
 0x168   : > { %v744_v4 = vpop.f32.mrf.mxu0 }
 0x169   : > { %v880_v5 = vpop.f32.mrf.mxu1 }
 0x16a   : > { %v746_v6 = vpop.f32.mrf.mxu0 }
 0x16b   : > { %v882_v7 = vpop.f32.mrf.mxu1  ;;  %4109 = vmatprep.subr.msk.mxu1 %vm892_vm0, %v746_v6 }
 0x16c   : > { %4113 = vmatprep.subr.msk.mxu0 %vm892_vm0, %v882_v7  ;;  %4110 = vmatpush1.msk.msra.mxu1 %vm892_vm0, %v744_v4 }
 0x16d   : > { %4114 = vmatpush1.msk.msra.mxu0 %vm892_vm0, %v880_v5  ;;  %4111 = vmatmul.mubr.msk.f32.vlgmr.msra.gmra.mxu1 %vm888_vm1, %v885_v8  ;;  %v1737_v8 = vld [vmem:[#allocation6 + $0x248] sm:$0xff] }
 0x16e   : > { %4115 = vmatmul.mubr.msk.f32.vlgmr.msra.gmra.mxu0 %vm888_vm1, %v4112_v9  ;;  %4121 = vmatprep.subr.msk.mxu0 %vm892_vm0, %v746_v6  ;;  %v1194_v9 = vld [vmem:[#allocation6 + $0x1f0] sm:$0xff] }
 0x16f   : > { %4118 = vmatprep.subr.msk.mxu1 %vm892_vm0, %v676_v63  ;;  %4122 = vmatpush1.msk.msra.mxu0 %vm892_vm0, %v744_v4 }
 0x170   : > { %4119 = vmatpush1.msk.msra.mxu1 %vm892_vm0, %v5138_v56  ;;  %1267 = vmatprep.mubr.f32.mxu1 %v4920_v2 }
 0x171   : > { %1341 = vmatprep.mubr.f32.mxu0 %v4920_v2  ;;  %4125 = vmatprep.subr.msk.mxu1 %vm892_vm0, %v882_v7 }
 0x172   : > { %4120 = vmatmul.mubr.msk.f32.vlgmr.msra.gmra.mxu1 %vm888_vm1, %v4117_v10  ;;  %4123 = vmatmul.mubr.msk.f32.vlgmr.msra.gmra.mxu0 %vm888_vm1, %v4116_v11  ;;  %v1736_v10 = vld [vmem:[#allocation6 + $0x240] sm:$0xff]  ;;  %v1193_v11 = vld [vmem:[#allocation6 + $0x1e8] sm:$0xff] }
 0x173   : > { %4126 = vmatpush1.msk.msra.mxu1 %vm892_vm0, %v880_v5  ;;  %1417 = vmatprep.mubr.f32.mxu1 %v4920_v2 }
 0x174   : > { %4130 = vmatprep.subr.msk.mxu1 %vm892_vm0, %v676_v63  ;;  %1426 = vmatprep.subr.mxu0 %v1163_v12  ;;  %v1741_v63 = vld [vmem:[#allocation6 + $0x268] sm:$0xff]  ;;  %v1735_v12 = vld [vmem:[#allocation6 + $0x238] sm:$0xff] }
 0x175   : > { %1427 = vmatpush1.msra.mxu0 %v1162_v14  ;;  %v1734_v14 = vld [vmem:[#allocation6 + $0x230] sm:$0xff] }
 0x176   : > { %4127 = vmatmul.mubr.msk.f32.vlgmr.msra.gmra.mxu1 %vm888_vm1, %v4124_v13  ;;  %1428 = vmatprep.subr.mxu0 %v1161_v15  ;;  %v1192_v13 = vld [vmem:[#allocation6 + $0x1e0] sm:$0xff]  ;;  %v1191_v15 = vld [vmem:[#allocation6 + $0x1d8] sm:$0xff] }
 0x177   : > { %4131 = vmatpush1.msk.msra.mxu1 %vm892_vm0, %v5138_v56  ;;  %1568 = vmatprep.mubr.f32.mxu1 %v4920_v2  ;;  %v1138_v56 = vld [vmem:[#allocation6 + $0x30] sm:$0xff] }
 0x178   : > { %4133 = vmatprep.subr.msk.mxu1 %vm892_vm0, %v746_v6  ;;  %1429 = vmatpush1.msra.mxu0 %v1160_v16  ;;  %v1738_v6 = vld [vmem:[#allocation6 + $0x250] sm:$0xff]  ;;  %v1733_v16 = vld [vmem:[#allocation6 + $0x228] sm:$0xff] }
 0x179   : > { %1430 = vmatprep.subr.mxu0 %v1159_v18  ;;  %v1732_v18 = vld [vmem:[#allocation6 + $0x220] sm:$0xff] }
 0x17a   : > { %4132 = vmatmul.mubr.msk.f32.vlgmr.msra.gmra.mxu1 %vm888_vm1, %v4129_v17  ;;  %1431 = vmatpush1.msra.mxu0 %v1158_v19  ;;  %v1190_v17 = vld [vmem:[#allocation6 + $0x1d0] sm:$0xff]  ;;  %v1189_v19 = vld [vmem:[#allocation6 + $0x1c8] sm:$0xff] }
 0x17b   : > { %4134 = vmatpush1.msk.msra.mxu1 %vm892_vm0, %v744_v4  ;;  %1642 = vmatprep.mubr.f32.mxu1 %v4920_v2  ;;  %v1739_v4 = vld [vmem:[#allocation6 + $0x258] sm:$0xff] }
 0x17c   : > { %4137 = vmatprep.subr.msk.mxu1 %vm892_vm0, %v882_v7  ;;  %1432 = vmatprep.subr.mxu0 %v1157_v20  ;;  %v1195_v7 = vld [vmem:[#allocation6 + $0x1f8] sm:$0xff] }
 0x17d   : > { %1433 = vmatpush1.msra.mxu0 %v1156_v22  ;;  %v1731_v20 = vld [vmem:[#allocation6 + $0x218] sm:$0xff]  ;;  %v1730_v22 = vld [vmem:[#allocation6 + $0x210] sm:$0xff] }
 0x17e   : > { %4135 = vmatmul.mubr.msk.f32.vlgmr.msra.gmra.mxu1 %vm888_vm1, %v4128_v21  ;;  %1434 = vmatprep.subr.mxu0 %v1155_v23  ;;  %v1188_v21 = vld [vmem:[#allocation6 + $0x1c0] sm:$0xff]  ;;  %v1187_v23 = vld [vmem:[#allocation6 + $0x1b8] sm:$0xff] }
 0x17f   : > { %4138 = vmatpush1.msk.msra.mxu1 %vm892_vm0, %v880_v5  ;;  %1718 = vmatprep.mubr.f32.mxu1 %v4920_v2  ;;  %v1132_v5 = vld [vmem:[#allocation6] sm:$0xff] }
 0x180   : > { %1792 = vmatprep.subr.mxu1 %v1759_v24  ;;  %1435 = vmatpush1.msra.mxu0 %v1154_v25  ;;  %v1729_v24 = vld [vmem:[#allocation6 + $0x208] sm:$0xff]  ;;  %v1186_v25 = vld [vmem:[#allocation6 + $0x1b0] sm:$0xff] }
 0x181   : > { %1436 = vmatprep.subr.mxu0 %v1153_v27  ;;  %v1185_v27 = vld [vmem:[#allocation6 + $0x1a8] sm:$0xff] }
 0x182   : > { %4139 = vmatmul.mubr.msk.f32.vlgmr.msra.gmra.mxu1 %vm888_vm1, %v4136_v26  ;;  %1437 = vmatpush1.msra.mxu0 %v1152_v28  ;;  %v1728_v26 = vld [vmem:[#allocation6 + $0x200] sm:$0xff]  ;;  %v1791_v28 = vld [vmem:[#allocation6 + $0x3f8] sm:$0xff] }
 0x183   : > { %1793 = vmatpush1.msra.mxu1 %v1758_v29  ;;  %1438 = vmatprep.subr.mxu0 %v1151_v30  ;;  %v1184_v29 = vld [vmem:[#allocation6 + $0x1a0] sm:$0xff]  ;;  %v1790_v30 = vld [vmem:[#allocation6 + $0x3f0] sm:$0xff] }
 0x184   : > { %1794 = vmatprep.subr.mxu1 %v1757_v31  ;;  %1439 = vmatpush1.msra.mxu0 %v1150_v32  ;;  %v1183_v31 = vld [vmem:[#allocation6 + $0x198] sm:$0xff]  ;;  %v1789_v32 = vld [vmem:[#allocation6 + $0x3e8] sm:$0xff] }
 0x185   : > { %1795 = vmatpush1.msra.mxu1 %v1756_v33  ;;  %1440 = vmatprep.subr.mxu0 %v1149_v34  ;;  %v1182_v33 = vld [vmem:[#allocation6 + $0x190] sm:$0xff]  ;;  %v1788_v34 = vld [vmem:[#allocation6 + $0x3e0] sm:$0xff] }
 0x186   : > { %1796 = vmatprep.subr.mxu1 %v1755_v35  ;;  %1441 = vmatpush1.msra.mxu0 %v1148_v36  ;;  %v1181_v35 = vld [vmem:[#allocation6 + $0x188] sm:$0xff]  ;;  %v1787_v36 = vld [vmem:[#allocation6 + $0x3d8] sm:$0xff] }
 0x187   : > { %1797 = vmatpush1.msra.mxu1 %v1754_v37  ;;  %1442 = vmatprep.subr.mxu0 %v1147_v38  ;;  %v1180_v37 = vld [vmem:[#allocation6 + $0x180] sm:$0xff]  ;;  %v1786_v38 = vld [vmem:[#allocation6 + $0x3d0] sm:$0xff] }
 0x188   : > { %1798 = vmatprep.subr.mxu1 %v1753_v39  ;;  %1443 = vmatpush1.msra.mxu0 %v1146_v40  ;;  %v1179_v39 = vld [vmem:[#allocation6 + $0x178] sm:$0xff]  ;;  %v1178_v40 = vld [vmem:[#allocation6 + $0x170] sm:$0xff] }
 0x189   : > { %1799 = vmatpush1.msra.mxu1 %v1752_v41  ;;  %1444 = vmatprep.subr.mxu0 %v1145_v42  ;;  %v1177_v41 = vld [vmem:[#allocation6 + $0x168] sm:$0xff]  ;;  %v1176_v42 = vld [vmem:[#allocation6 + $0x160] sm:$0xff] }
 0x18a   : > { %1800 = vmatprep.subr.mxu1 %v1751_v43  ;;  %1445 = vmatpush1.msra.mxu0 %v1144_v44  ;;  %v1175_v43 = vld [vmem:[#allocation6 + $0x158] sm:$0xff]  ;;  %v1174_v44 = vld [vmem:[#allocation6 + $0x150] sm:$0xff] }
 0x18b   : > { %1801 = vmatpush1.msra.mxu1 %v1750_v45  ;;  %1446 = vmatprep.subr.mxu0 %v1143_v46  ;;  %v1173_v45 = vld [vmem:[#allocation6 + $0x148] sm:$0xff]  ;;  %v1172_v46 = vld [vmem:[#allocation6 + $0x140] sm:$0xff] }
 0x18c   : > { %1802 = vmatprep.subr.mxu1 %v1749_v47  ;;  %1447 = vmatpush1.msra.mxu0 %v1142_v48  ;;  %v1171_v47 = vld [vmem:[#allocation6 + $0x138] sm:$0xff]  ;;  %v1785_v48 = vld [vmem:[#allocation6 + $0x3c8] sm:$0xff] }
 0x18d   : > { %1803 = vmatpush1.msra.mxu1 %v1748_v49  ;;  %1448 = vmatprep.subr.mxu0 %v1141_v50  ;;  %v1170_v49 = vld [vmem:[#allocation6 + $0x130] sm:$0xff]  ;;  %v1784_v50 = vld [vmem:[#allocation6 + $0x3c0] sm:$0xff] }
 0x18e   : > { %1804 = vmatprep.subr.mxu1 %v1747_v51  ;;  %1449 = vmatpush1.msra.mxu0 %v1140_v52  ;;  %v1169_v51 = vld [vmem:[#allocation6 + $0x128] sm:$0xff]  ;;  %v1783_v52 = vld [vmem:[#allocation6 + $0x3b8] sm:$0xff] }
 0x18f   : > { %1805 = vmatpush1.msra.mxu1 %v1746_v53  ;;  %1450 = vmatprep.subr.mxu0 %v1139_v54  ;;  %v1168_v53 = vld [vmem:[#allocation6 + $0x120] sm:$0xff]  ;;  %v1782_v54 = vld [vmem:[#allocation6 + $0x3b0] sm:$0xff] }
 0x190   : > { %1806 = vmatprep.subr.mxu1 %v1745_v55  ;;  %1451 = vmatpush1.msra.mxu0 %v1138_v56  ;;  %v1167_v55 = vld [vmem:[#allocation6 + $0x118] sm:$0xff]  ;;  %v1781_v56 = vld [vmem:[#allocation6 + $0x3a8] sm:$0xff] }
 0x191   : > { %1807 = vmatpush1.msra.mxu1 %v1744_v57  ;;  %1452 = vmatprep.subr.mxu0 %v1137_v58  ;;  %v1166_v57 = vld [vmem:[#allocation6 + $0x110] sm:$0xff]  ;;  %v1780_v58 = vld [vmem:[#allocation6 + $0x3a0] sm:$0xff] }
 0x192   : > { %1808 = vmatprep.subr.mxu1 %v1743_v59  ;;  %1453 = vmatpush1.msra.mxu0 %v1136_v60  ;;  %v1165_v59 = vld [vmem:[#allocation6 + $0x108] sm:$0xff]  ;;  %v1779_v60 = vld [vmem:[#allocation6 + $0x398] sm:$0xff] }
 0x193   : > { %1809 = vmatpush1.msra.mxu1 %v1742_v61  ;;  %1454 = vmatprep.subr.mxu0 %v1135_v62  ;;  %v1164_v61 = vld [vmem:[#allocation6 + $0x100] sm:$0xff]  ;;  %v1778_v62 = vld [vmem:[#allocation6 + $0x390] sm:$0xff] }
 0x194   : > { %1810 = vmatprep.subr.mxu1 %v1741_v63  ;;  %1455 = vmatpush1.msra.mxu0 %v1134_v0  ;;  %v1777_v63 = vld [vmem:[#allocation6 + $0x388] sm:$0xff]  ;;  %v1776_v0 = vld [vmem:[#allocation6 + $0x380] sm:$0xff] }
 0x195   : > { %1811 = vmatpush1.msra.mxu1 %v1740_v1  ;;  %1456 = vmatprep.subr.mxu0 %v1133_v3  ;;  %v1775_v1 = vld [vmem:[#allocation6 + $0x378] sm:$0xff]  ;;  %v1774_v3 = vld [vmem:[#allocation6 + $0x370] sm:$0xff] }
 0x196   : > { %1812 = vmatprep.subr.mxu1 %v1739_v4  ;;  %1457 = vmatpush1.msra.mxu0 %v1132_v5  ;;  %v1773_v4 = vld [vmem:[#allocation6 + $0x368] sm:$0xff]  ;;  %v1772_v5 = vld [vmem:[#allocation6 + $0x360] sm:$0xff] }
 0x197   : > { %1813 = vmatpush1.msra.mxu1 %v1738_v6  ;;  %1458 = vmatprep.subr.mxu0 %v1195_v7  ;;  %v1771_v6 = vld [vmem:[#allocation6 + $0x358] sm:$0xff]  ;;  %v1770_v7 = vld [vmem:[#allocation6 + $0x350] sm:$0xff] }
 0x198   : > { %1814 = vmatprep.subr.mxu1 %v1737_v8  ;;  %1459 = vmatpush2.msra.mxu0 %v1194_v9  ;;  %v1769_v8 = vld [vmem:[#allocation6 + $0x348] sm:$0xff]  ;;  %v1768_v9 = vld [vmem:[#allocation6 + $0x340] sm:$0xff] }
 0x199   : > { %1815 = vmatpush1.msra.mxu1 %v1736_v10  ;;  %1460 = vmatprep.subr.mxu0 %v1193_v11  ;;  %v1767_v10 = vld [vmem:[#allocation6 + $0x338] sm:$0xff]  ;;  %v1766_v11 = vld [vmem:[#allocation6 + $0x330] sm:$0xff] }
 0x19a   : > { %1816 = vmatprep.subr.mxu1 %v1735_v12  ;;  %1461 = vmatpush2.msra.mxu0 %v1192_v13  ;;  %v1765_v12 = vld [vmem:[#allocation6 + $0x328] sm:$0xff]  ;;  %v1764_v13 = vld [vmem:[#allocation6 + $0x320] sm:$0xff] }
 0x19b   : > { %1817 = vmatpush1.msra.mxu1 %v1734_v14  ;;  %1462 = vmatprep.subr.mxu0 %v1191_v15  ;;  %v1763_v14 = vld [vmem:[#allocation6 + $0x318] sm:$0xff]  ;;  %v1762_v15 = vld [vmem:[#allocation6 + $0x310] sm:$0xff] }
 0x19c   : > { %1818 = vmatprep.subr.mxu1 %v1733_v16  ;;  %1463 = vmatpush2.msra.mxu0 %v1190_v17  ;;  %v1761_v16 = vld [vmem:[#allocation6 + $0x308] sm:$0xff]  ;;  %v1760_v17 = vld [vmem:[#allocation6 + $0x300] sm:$0xff] }
 0x19d   : > { %1819 = vmatpush1.msra.mxu1 %v1732_v18  ;;  %1464 = vmatprep.subr.mxu0 %v1189_v19  ;;  %v1865_v18 = vld [vmem:[%s5458_s2] sm:$0xf] }
 0x19e   : > { %1820 = vmatprep.subr.mxu1 %v1731_v20  ;;  %1465 = vmatpush2.msra.mxu0 %v1188_v21  ;;  %v1906_v19 = vld [vmem:[#allocation7 + $0xf8] sm:$0xff]  ;;  %v4921_v20 = vmov 0  }
 0x19f   : > { %1821 = vmatpush1.msra.mxu1 %v1730_v22  ;;  %1466 = vmatprep.subr.mxu0 %v1187_v23  ;;  %v2009_v21 = vld [vmem:[#allocation7 + $0x1f8] sm:$0xff]  ;;  %v963_v23 = vpop.f32.mrf.mxu0 }
 0x1a0   : > { %1822 = vmatprep.subr.mxu1 %v1729_v24  ;;  %1467 = vmatpush2.msra.mxu0 %v1186_v25  ;;  %v3299_v22 = vld [vmem:[%s5460_s4] sm:$0xf] }
 0x1a1   : > { %1823 = vmatpush1.msra.mxu1 %v1728_v26  ;;  %1468 = vmatprep.subr.mxu0 %v1185_v27  ;;  %v965_v24 = vpop.f32.mrf.mxu0 }
 0x1a2   : > { %1824 = vmatprep.subr.mxu1 %v1791_v28  ;;  %1469 = vmatpush2.msra.mxu0 %v1184_v29 }
 0x1a3   : > { %1825 = vmatpush2.msra.mxu1 %v1790_v30  ;;  %1470 = vmatprep.subr.mxu0 %v1183_v31 }
 0x1a4   : > { %1826 = vmatprep.subr.mxu1 %v1789_v32  ;;  %1471 = vmatpush2.msra.mxu0 %v1182_v33 }
 0x1a5   : > { %1827 = vmatpush2.msra.mxu1 %v1788_v34  ;;  %1472 = vmatprep.subr.mxu0 %v1181_v35 }
 0x1a6   : > { %1828 = vmatprep.subr.mxu1 %v1787_v36  ;;  %1473 = vmatpush2.msra.mxu0 %v1180_v37  ;;  %v1890_v36 = vld [vmem:[#allocation7 + $0x78] sm:$0xff] }
 0x1a7   : > { %1829 = vmatpush2.msra.mxu1 %v1786_v38  ;;  %1474 = vmatprep.subr.mxu0 %v1179_v39  ;;  %v1905_v39 = vld [vmem:[#allocation7 + $0xf0] sm:$0xff] }
 0x1a8   : > { %1475 = vmatpush2.msra.mxu0 %v1178_v40  ;;  %1830 = vmatprep.subr.mxu1 %v1785_v48 }
 0x1a9   : > { %1476 = vmatprep.subr.mxu0 %v1177_v41  ;;  %1831 = vmatpush2.msra.mxu1 %v1784_v50  ;;  %v1889_v41 = vld [vmem:[#allocation7 + $0x70] sm:$0xff] }
 0x1aa   : > { %1477 = vmatpush2.msra.mxu0 %v1176_v42  ;;  %1832 = vmatprep.subr.mxu1 %v1783_v52 }
 0x1ab   : > { %1478 = vmatprep.subr.mxu0 %v1175_v43  ;;  %1833 = vmatpush2.msra.mxu1 %v1782_v54 }
 0x1ac   : > { %1479 = vmatpush2.msra.mxu0 %v1174_v44  ;;  %1834 = vmatprep.subr.mxu1 %v1781_v56  ;;  %v1904_v44 = vld [vmem:[#allocation7 + $0xe8] sm:$0xff] }
 0x1ad   : > { %1480 = vmatprep.subr.mxu0 %v1173_v45  ;;  %1835 = vmatpush2.msra.mxu1 %v1780_v58  ;;  %v2008_v58 = vld [vmem:[#allocation7 + $0x1f0] sm:$0xff] }
 0x1ae   : > { %1481 = vmatpush2.msra.mxu0 %v1172_v46  ;;  %1836 = vmatprep.subr.mxu1 %v1779_v60  ;;  %v2007_v60 = vld [vmem:[#allocation7 + $0x1e8] sm:$0xff] }
 0x1af   : > { %1482 = vmatprep.subr.mxu0 %v1171_v47  ;;  %1837 = vmatpush2.msra.mxu1 %v1778_v62  ;;  %v1991_v62 = vld [vmem:[#allocation7 + $0x168] sm:$0xff] }
 0x1b0   : > { %1483 = vmatpush2.msra.mxu0 %v1170_v49  ;;  %1838 = vmatprep.subr.mxu1 %v1777_v63  ;;  %v1903_v63 = vld [vmem:[#allocation7 + $0xe0] sm:$0xff] }
 0x1b1   : > { %1484 = vmatprep.subr.mxu0 %v1169_v51  ;;  %1839 = vmatpush2.msra.mxu1 %v1776_v0  ;;  %v2006_v0 = vld [vmem:[#allocation7 + $0x1e0] sm:$0xff] }
 0x1b2   : > { %1485 = vmatpush2.msra.mxu0 %v1168_v53  ;;  %1840 = vmatprep.subr.mxu1 %v1775_v1  ;;  %v1887_v1 = vld [vmem:[#allocation7 + $0x60] sm:$0xff] }
 0x1b3   : > { %1486 = vmatprep.subr.mxu0 %v1167_v55  ;;  %1841 = vmatpush2.msra.mxu1 %v1774_v3  ;;  %v1990_v3 = vld [vmem:[#allocation7 + $0x160] sm:$0xff] }
 0x1b4   : > { %1487 = vmatpush2.msra.mxu0 %v1166_v57  ;;  %1842 = vmatprep.subr.mxu1 %v1773_v4  ;;  %v1993_v57 = vld [vmem:[#allocation7 + $0x178] sm:$0xff] }
 0x1b5   : > { %1488 = vmatprep.subr.mxu0 %v1165_v59  ;;  %1843 = vmatpush2.msra.mxu1 %v1772_v5  ;;  %v1992_v59 = vld [vmem:[#allocation7 + $0x170] sm:$0xff]  ;;  %v1902_v4 = vld [vmem:[#allocation7 + $0xd8] sm:$0xff] }
 0x1b6   : > { %1489 = vmatpush2.msra.mxu0 %v1164_v61  ;;  %1844 = vmatprep.subr.mxu1 %v1771_v6  ;;  %v1888_v61 = vld [vmem:[#allocation7 + $0x68] sm:$0xff]  ;;  %v2005_v5 = vld [vmem:[#allocation7 + $0x1d8] sm:$0xff] }
 0x1b7   : > { %1845 = vmatpush2.msra.mxu1 %v1770_v7  ;;  %4720 = vset.pattern.permute.xlu0 %v4921_v20  ;;  %v1886_v6 = vld [vmem:[#allocation7 + $0x58] sm:$0xff] }
 0x1b8   : > { %1846 = vmatprep.subr.mxu1 %v1769_v8  ;;  %4186 = vmatprep.subr.mxu0 %v1906_v19  ;;  %v1989_v7 = vld [vmem:[#allocation7 + $0x158] sm:$0xff]  ;;  %v1901_v8 = vld [vmem:[#allocation7 + $0xd0] sm:$0xff]  ;;  %v1986_v19 = vld [vmem:[#allocation7 + $0x140] sm:$0xff] }
 0x1b9   : > { %1847 = vmatpush2.msra.mxu1 %v1768_v9  ;;  %1868 = vperm.xlu0 %4720, %v1865_v18   ;;  %v2004_v9 = vld [vmem:[#allocation7 + $0x1d0] sm:$0xff]  ;;  %v1883_v18 = vld [vmem:[#allocation7 + $0x40] sm:$0xff] }
 0x1ba   : > { %1848 = vmatprep.subr.mxu1 %v1767_v10  ;;  %4721 = vset.pattern.permute.xlu1 %v4921_v20  ;;  %v1885_v10 = vld [vmem:[#allocation7 + $0x50] sm:$0xff]  ;;  %v1898_v20 = vld [vmem:[#allocation7 + $0xb8] sm:$0xff] }
 0x1bb   : > { %1849 = vmatpush2.msra.mxu1 %v1766_v11  ;;  %v1988_v11 = vld [vmem:[#allocation7 + $0x150] sm:$0xff] }
 0x1bc   : > { %1850 = vmatprep.subr.mxu1 %v1765_v12  ;;  %v1900_v12 = vld [vmem:[#allocation7 + $0xc8] sm:$0xff] }
 0x1bd   : > { %1851 = vmatpush2.msra.mxu1 %v1764_v13  ;;  %3302 = vperm.xlu0 %4720, %v3299_v22   ;;  %v2003_v13 = vld [vmem:[#allocation7 + $0x1c8] sm:$0xff]  ;;  %v1882_v22 = vld [vmem:[#allocation7 + $0x38] sm:$0xff] }
 0x1be   : > { %1852 = vmatprep.subr.mxu1 %v1763_v14  ;;  %v1884_v14 = vld [vmem:[#allocation7 + $0x48] sm:$0xff] }
 0x1bf   : > { %1853 = vmatpush2.msra.mxu1 %v1762_v15  ;;  %v1987_v15 = vld [vmem:[#allocation7 + $0x148] sm:$0xff] }
 0x1c0   : > { %1854 = vmatprep.subr.mxu1 %v1761_v16  ;;  %v1899_v16 = vld [vmem:[#allocation7 + $0xc0] sm:$0xff] }
 0x1c1   : > { %1855 = vmatpush2.msra.mxu1 %v1760_v17  ;;  %v2002_v17 = vld [vmem:[#allocation7 + $0x1c0] sm:$0xff] }
 0x1c2   : > { %4221 = vmatprep.subr.mxu1 %v2009_v21  ;;  %v2001_v21 = vld [vmem:[#allocation7 + $0x1b8] sm:$0xff] }
 0x22d   : > { %v1043_v25 = vpop.f32.mrf.mxu1 }
 0x22e   : > { %v1125_v26 = vpop.f32.mrf.mxu0  ;;  %v1044_v27 = vadd.f32 %v1043_v25, %v963_v23  ;;  %v1985_v23 = vld [vmem:[#allocation7 + $0x138] sm:$0xff]  ;;  %v2000_v25 = vld [vmem:[#allocation7 + $0x1b0] sm:$0xff] }
 0x22f   : > { %v1045_v28 = vpop.f32.mrf.mxu1 }
 0x230   : > { %v1127_v29 = vpop.f32.mrf.mxu0  ;;  %v1046_v30 = vadd.f32 %v1045_v28, %v965_v24  ;;  %v1130_v34 = vadd.f32 %v1125_v26, %v1044_v27  ;;  %v1897_v24 = vld [vmem:[#allocation7 + $0xb0] sm:$0xff]  ;;  %v1896_v28 = vld [vmem:[#allocation7 + $0xa8] sm:$0xff] }
 0x231   : > { %v1881_v26 = vld [vmem:[#allocation7 + $0x30] sm:$0xff] }
 0x232   : > { %v1269_v31 = vpop.f32.mrf.mxu1  ;;  %v1131_v32 = vadd.f32 %v1127_v29, %v1046_v30  ;;  %v1343_v33 = vpop.f32.mrf.mxu0  ;;  %v1984_v27 = vld [vmem:[#allocation7 + $0x130] sm:$0xff]  ;;  %v1999_v29 = vld [vmem:[#allocation7 + $0x1a8] sm:$0xff] }
 0x233   : > { %v1344_v37 = vadd.f32 %v1343_v33, %v1269_v31  ;;  %v1880_v30 = vld [vmem:[#allocation7 + $0x28] sm:$0xff]  ;;  %v1998_v33 = vld [vmem:[#allocation7 + $0x1a0] sm:$0xff] }
 0x234   : > { %v1271_v35 = vpop.f32.mrf.mxu1  ;;  %v1345_v38 = vpop.f32.mrf.mxu0  ;;  %1490 = vmatprep.mubr.f32.mxu0 %v1131_v32  ;;  %v1983_v31 = vld [vmem:[#allocation7 + $0x128] sm:$0xff]  ;;  %v1895_v32 = vld [vmem:[#allocation7 + $0xa0] sm:$0xff] }
 0x235   : > { %1491 = vmatmul.mubr.f32.vlgmr.msra.gmra.mxu0 %v1130_v34  ;;  %v1346_v42 = vadd.f32 %v1345_v38, %v1271_v35  ;;  %v1879_v34 = vld [vmem:[#allocation7 + $0x20] sm:$0xff]  ;;  %v1878_v38 = vld [vmem:[#allocation7 + $0x18] sm:$0xff] }
 0x236   : > { %v1419_v40 = vpop.f32.mrf.mxu1  ;;  %4187 = vmatpush3.msra.mxu0 %v1890_v36  ;;  %v1982_v35 = vld [vmem:[#allocation7 + $0x120] sm:$0xff]  ;;  %v1894_v36 = vld [vmem:[#allocation7 + $0x98] sm:$0xff] }
 0x237   : > { %v5216_v43 = vadd.f32 %v1419_v40, %v1344_v37  ;;  %4188 = vmatprep.subr.mxu0 %v1905_v39  ;;  %v1997_v37 = vld [vmem:[#allocation7 + $0x198] sm:$0xff]  ;;  %v1893_v40 = vld [vmem:[#allocation7 + $0x90] sm:$0xff] }
 0x238   : > { %v1421_v45 = vpop.f32.mrf.mxu1  ;;  %4189 = vmatpush3.msra.mxu0 %v1889_v41  ;;  %v1981_v39 = vld [vmem:[#allocation7 + $0x118] sm:$0xff]  ;;  %v1996_v41 = vld [vmem:[#allocation7 + $0x190] sm:$0xff] }
 0x239   : > { %v5218_v46 = vadd.f32 %v1421_v45, %v1346_v42  ;;  %4190 = vmatprep.subr.mxu0 %v1904_v44  ;;  %v1877_v42 = vld [vmem:[#allocation7 + $0x10] sm:$0xff]  ;;  %v1892_v45 = vld [vmem:[#allocation7 + $0x88] sm:$0xff] }
 0x23a   : > { %v1570_v47 = vpop.f32.mrf.mxu1  ;;  %4191 = vmatpush3.msra.mxu0 %v1888_v61  ;;  %v1980_v44 = vld [vmem:[#allocation7 + $0x110] sm:$0xff] }
 0x23b   : > { %4192 = vmatprep.subr.mxu0 %v1903_v63  ;;  %v1869_v63 = vpop.permute.xlu0 %1868 }
 0x23c   : > { %v1572_v48 = vpop.f32.mrf.mxu1  ;;  %4193 = vmatpush3.msra.mxu0 %v1887_v1 }
 0x23d   : > { %4194 = vmatprep.subr.mxu0 %v1902_v4 }
 0x23e   : > { %v1644_v49 = vpop.f32.mrf.mxu1  ;;  %4195 = vmatpush3.msra.mxu0 %v1886_v6  ;;  %v2096_v6 = vld [vmem:[#allocation7 + $0x278] sm:$0xff] }
 0x23f   : > { %v1645_v53 = vadd.f32 %v1644_v49, %v1570_v47  ;;  %4196 = vmatprep.subr.mxu0 %v1901_v8  ;;  %v1995_v47 = vld [vmem:[#allocation7 + $0x188] sm:$0xff]  ;;  %v2111_v8 = vld [vmem:[#allocation7 + $0x2f0] sm:$0xff] }
 0x240   : > { %v1646_v50 = vpop.f32.mrf.mxu1  ;;  %4197 = vmatpush3.msra.mxu0 %v1885_v10  ;;  %v1979_v49 = vld [vmem:[#allocation7 + $0x108] sm:$0xff] }
 0x241   : > { %v1647_v52 = vadd.f32 %v1646_v50, %v1572_v48  ;;  %4198 = vmatprep.subr.mxu0 %v1900_v12  ;;  %v1876_v48 = vld [vmem:[#allocation7 + $0x8] sm:$0xff]  ;;  %v1891_v50 = vld [vmem:[#allocation7 + $0x80] sm:$0xff] }
 0x242   : > { %v1720_v51 = vpop.f32.mrf.mxu1  ;;  %4199 = vmatpush3.msra.mxu0 %v1884_v14  ;;  %v2110_v10 = vld [vmem:[#allocation7 + $0x2e8] sm:$0xff]  ;;  %v2109_v14 = vld [vmem:[#allocation7 + $0x2e0] sm:$0xff] }
 0x243   : > { %v1725_v56 = vadd.f32 %v1720_v51, %v1645_v53  ;;  %4200 = vmatprep.subr.mxu0 %v1899_v16  ;;  %v1994_v51 = vld [vmem:[#allocation7 + $0x180] sm:$0xff]  ;;  %v2094_v12 = vld [vmem:[#allocation7 + $0x268] sm:$0xff] }
 0x244   : > { %v1722_v54 = vpop.f32.mrf.mxu1  ;;  %4201 = vmatpush3.msra.mxu0 %v1883_v18  ;;  %v1978_v53 = vld [vmem:[#allocation7 + $0x100] sm:$0xff]  ;;  %v2108_v18 = vld [vmem:[#allocation7 + $0x2d8] sm:$0xff] }
 0x245   : > { %v1726_v55 = vadd.f32 %v1722_v54, %v1647_v52  ;;  %4202 = vmatprep.subr.mxu0 %v1898_v20  ;;  %v1875_v52 = vld [vmem:[#allocation7] sm:$0xff]  ;;  %v2112_v54 = vld [vmem:[#allocation7 + $0x2f8] sm:$0xff] }
 0x246   : > { %4203 = vmatpush3.msra.mxu0 %v1882_v22  ;;  %v2093_v16 = vld [vmem:[#allocation7 + $0x260] sm:$0xff]  ;;  %v2092_v20 = vld [vmem:[#allocation7 + $0x258] sm:$0xff]  ;;  %v2107_v22 = vld [vmem:[#allocation7 + $0x2d0] sm:$0xff] }
 0x247   : > { %1856 = vmatprep.mubr.f32.mxu1 %v1726_v55  ;;  %4204 = vmatprep.subr.mxu0 %v1897_v24  ;;  %v2215_v55 = vld [vmem:[#allocation7 + $0x3f8] sm:$0xff]  ;;  %v2091_v24 = vld [vmem:[#allocation7 + $0x250] sm:$0xff] }
 0x248   : > { %1857 = vmatmul.mubr.f32.vlgmr.msra.gmra.mxu1 %v1725_v56  ;;  %4205 = vmatpush3.msra.mxu0 %v1881_v26  ;;  %v2106_v26 = vld [vmem:[#allocation7 + $0x2c8] sm:$0xff] }
 0x249   : > { %4222 = vmatpush3.msra.mxu1 %v1993_v57  ;;  %4206 = vmatprep.subr.mxu0 %v1896_v28  ;;  %v2090_v28 = vld [vmem:[#allocation7 + $0x248] sm:$0xff] }
 0x24a   : > { %4223 = vmatprep.subr.mxu1 %v2008_v58  ;;  %4207 = vmatpush3.msra.mxu0 %v1880_v30  ;;  %v2105_v30 = vld [vmem:[#allocation7 + $0x2c0] sm:$0xff] }
 0x24b   : > { %4224 = vmatpush3.msra.mxu1 %v1992_v59  ;;  %4208 = vmatprep.subr.mxu0 %v1895_v32  ;;  %v2089_v32 = vld [vmem:[#allocation7 + $0x240] sm:$0xff] }
 0x24c   : > { %4225 = vmatprep.subr.mxu1 %v2007_v60  ;;  %4209 = vmatpush3.msra.mxu0 %v1879_v34  ;;  %v2104_v34 = vld [vmem:[#allocation7 + $0x2b8] sm:$0xff] }
 0x24d   : > { %4226 = vmatpush3.msra.mxu1 %v1991_v62  ;;  %4210 = vmatprep.subr.mxu0 %v1894_v36  ;;  %v2088_v36 = vld [vmem:[#allocation7 + $0x238] sm:$0xff] }
 0x24e   : > { %4227 = vmatprep.subr.mxu1 %v2006_v0  ;;  %4211 = vmatpush3.msra.mxu0 %v1878_v38  ;;  %v2103_v38 = vld [vmem:[#allocation7 + $0x2b0] sm:$0xff] }
 0x24f   : > { %4228 = vmatpush3.msra.mxu1 %v1990_v3  ;;  %4212 = vmatprep.subr.mxu0 %v1893_v40  ;;  %v2087_v40 = vld [vmem:[#allocation7 + $0x230] sm:$0xff] }
 0x250   : > { %4229 = vmatprep.subr.mxu1 %v2005_v5  ;;  %4213 = vmatpush3.msra.mxu0 %v1877_v42  ;;  %v2102_v42 = vld [vmem:[#allocation7 + $0x2a8] sm:$0xff] }
 0x251   : > { %4230 = vmatpush3.msra.mxu1 %v1989_v7  ;;  %4214 = vmatprep.subr.mxu0 %v1892_v45  ;;  %v2199_v7 = vld [vmem:[#allocation7 + $0x378] sm:$0xff]  ;;  %v2086_v45 = vld [vmem:[#allocation7 + $0x228] sm:$0xff] }
 0x252   : > { %4231 = vmatprep.subr.mxu1 %v2004_v9  ;;  %4215 = vmatpush3.msra.mxu0 %v1876_v48  ;;  %v2198_v9 = vld [vmem:[#allocation7 + $0x370] sm:$0xff]  ;;  %v2101_v48 = vld [vmem:[#allocation7 + $0x2a0] sm:$0xff] }
 0x253   : > { %4232 = vmatpush3.msra.mxu1 %v1988_v11  ;;  %4216 = vmatprep.subr.mxu0 %v1891_v50  ;;  %v2213_v11 = vld [vmem:[#allocation7 + $0x3e8] sm:$0xff]  ;;  %v2085_v50 = vld [vmem:[#allocation7 + $0x220] sm:$0xff] }
 0x254   : > { %4233 = vmatprep.subr.mxu1 %v2003_v13  ;;  %4217 = vmatpush3.msra.mxu0 %v1875_v52  ;;  %v2197_v13 = vld [vmem:[#allocation7 + $0x368] sm:$0xff]  ;;  %v2100_v52 = vld [vmem:[#allocation7 + $0x298] sm:$0xff] }
 0x255   : > { %4234 = vmatpush3.msra.mxu1 %v1987_v15  ;;  %4256 = vmatprep.subr.mxu0 %v2112_v54  ;;  %v2212_v15 = vld [vmem:[#allocation7 + $0x3e0] sm:$0xff]  ;;  %v2084_v54 = vld [vmem:[#allocation7 + $0x218] sm:$0xff] }
 0x256   : > { %4235 = vmatprep.subr.mxu1 %v2002_v17  ;;  %v2196_v17 = vld [vmem:[#allocation7 + $0x360] sm:$0xff] }
 0x257   : > { %4236 = vmatpush3.msra.mxu1 %v1986_v19  ;;  %v2211_v19 = vld [vmem:[#allocation7 + $0x3d8] sm:$0xff] }
 0x258   : > { %4237 = vmatprep.subr.mxu1 %v2001_v21  ;;  %v2195_v21 = vld [vmem:[#allocation7 + $0x358] sm:$0xff] }
 0x259   : > { %4238 = vmatpush3.msra.mxu1 %v1985_v23  ;;  %v2210_v23 = vld [vmem:[#allocation7 + $0x3d0] sm:$0xff] }
 0x25a   : > { %4239 = vmatprep.subr.mxu1 %v2000_v25  ;;  %v2194_v25 = vld [vmem:[#allocation7 + $0x350] sm:$0xff] }
 0x25b   : > { %4240 = vmatpush3.msra.mxu1 %v1984_v27  ;;  %v2209_v27 = vld [vmem:[#allocation7 + $0x3c8] sm:$0xff] }
 0x25c   : > { %4241 = vmatprep.subr.mxu1 %v1999_v29  ;;  %v2193_v29 = vld [vmem:[#allocation7 + $0x348] sm:$0xff] }
 0x25d   : > { %4242 = vmatpush3.msra.mxu1 %v1983_v31  ;;  %v2208_v31 = vld [vmem:[#allocation7 + $0x3c0] sm:$0xff] }
 0x25e   : > { %4243 = vmatprep.subr.mxu1 %v1998_v33  ;;  %v2192_v33 = vld [vmem:[#allocation7 + $0x340] sm:$0xff] }
 0x25f   : > { %4244 = vmatpush3.msra.mxu1 %v1982_v35  ;;  %v2207_v35 = vld [vmem:[#allocation7 + $0x3b8] sm:$0xff] }
 0x260   : > { %4245 = vmatprep.subr.mxu1 %v1997_v37  ;;  %v2191_v37 = vld [vmem:[#allocation7 + $0x338] sm:$0xff] }
 0x261   : > { %4246 = vmatpush3.msra.mxu1 %v1981_v39  ;;  %v2206_v39 = vld [vmem:[#allocation7 + $0x3b0] sm:$0xff] }
 0x262   : > { %4247 = vmatprep.subr.mxu1 %v1996_v41  ;;  %v2190_v41 = vld [vmem:[#allocation7 + $0x330] sm:$0xff] }
 0x263   : > { %4248 = vmatpush3.msra.mxu1 %v1980_v44  ;;  %v2205_v44 = vld [vmem:[#allocation7 + $0x3a8] sm:$0xff] }
 0x264   : > { %4249 = vmatprep.subr.mxu1 %v1995_v47  ;;  %v2189_v47 = vld [vmem:[#allocation7 + $0x328] sm:$0xff] }
 0x265   : > { %4250 = vmatpush3.msra.mxu1 %v1979_v49  ;;  %v2204_v49 = vld [vmem:[#allocation7 + $0x3a0] sm:$0xff] }
 0x266   : > { %4251 = vmatprep.subr.mxu1 %v1994_v51  ;;  %v2188_v51 = vld [vmem:[#allocation7 + $0x320] sm:$0xff] }
 0x267   : > { %4252 = vmatpush3.msra.mxu1 %v1978_v53  ;;  %v2203_v53 = vld [vmem:[#allocation7 + $0x398] sm:$0xff] }
 0x268   : > { %4291 = vmatprep.subr.mxu1 %v2215_v55  ;;  %v2187_v55 = vld [vmem:[#allocation7 + $0x318] sm:$0xff] }
 0x2f5   : > { %v1492_v56 = vpop.f32.mrf.mxu0 }
 0x2f6   : > { %v1493_v58 = vadd.f32 %v1492_v56, %v5216_v43  ;;  %v2214_v43 = vld [vmem:[#allocation7 + $0x3f0] sm:$0xff] }
 0x2f7   : > { %v1494_v57 = vpop.f32.mrf.mxu0  ;;  %v2099_v56 = vld [vmem:[#allocation7 + $0x290] sm:$0xff] }
 0x2f8   : > { %v1495_v60 = vadd.f32 %v1494_v57, %v5218_v46  ;;  %v2095_v46 = vld [vmem:[#allocation7 + $0x270] sm:$0xff] }
 0x2f9   : > { %v2202_v57 = vld [vmem:[#allocation7 + $0x390] sm:$0xff] }
 0x308   : > { %v1858_v59 = vpop.f32.mrf.mxu1 }
 0x309   : > { %v1863_v61 = vadd.f32 %v1858_v59, %v1493_v58  ;;  %v2083_v58 = vld [vmem:[#allocation7 + $0x210] sm:$0xff] }
 0x30a   : > { %v1860_v62 = vpop.f32.mrf.mxu1  ;;  %v2186_v59 = vld [vmem:[#allocation7 + $0x310] sm:$0xff] }
 0x30b   : > { %v1864_v0 = vadd.f32 %v1860_v62, %v1495_v60  ;;  %v1871_v1 = vadd.f32 %v1869_v63, %v1863_v61  ;;  %v2098_v60 = vld [vmem:[#allocation7 + $0x288] sm:$0xff] }
 0x30c   : > { %v2201_v61 = vld [vmem:[#allocation7 + $0x388] sm:$0xff] }
 0x30d   : > { %v1872_v3 = vadd.f32 %v1869_v63, %v1864_v0  ;;  %v5222_v5 = vmax.f32 %v1871_v1, 0.0  ;;  %v2082_v62 = vld [vmem:[#allocation7 + $0x208] sm:$0xff]  ;;  %v2097_v0 = vld [vmem:[#allocation7 + $0x280] sm:$0xff] }
 0x30e   : > { %v2185_v63 = vld [vmem:[#allocation7 + $0x308] sm:$0xff]  ;;  %v2200_v1 = vld [vmem:[#allocation7 + $0x380] sm:$0xff] }
 0x30f   : > { %v1874_v4 = vmax.f32 %v1872_v3, 0.0  ;;  %v2081_v3 = vld [vmem:[#allocation7 + $0x200] sm:$0xff] }
 0x311   : > { %1971 = vmatprep.mubr.f32.mxu0 %v1874_v4  ;;  %2074 = vmatprep.mubr.f32.mxu1 %v1874_v4 }
 0x312   : > { %1972 = vmatmul.mubr.f32.vlgmr.msra.gmra.mxu0 %v5222_v5  ;;  %2075 = vmatmul.mubr.f32.vlgmr.msra.gmra.mxu1 %v5222_v5 }
 0x313   : > { %4257 = vmatpush3.msra.mxu0 %v2096_v6  ;;  %4292 = vmatpush3.msra.mxu1 %v2199_v7  ;;  %v2296_v6 = vld [vmem:[#allocation9 + $0x38] sm:$0xff] }
 0x314   : > { %4258 = vmatprep.subr.mxu0 %v2111_v8  ;;  %2177 = vmatprep.mubr.f32.mxu0 %v1874_v4  ;;  %v2379_v7 = vld [vmem:[#allocation9 + $0x78] sm:$0xff]  ;;  %v2295_v8 = vld [vmem:[#allocation9 + $0x30] sm:$0xff] }
 0x315   : > { %4293 = vmatprep.subr.mxu1 %v2214_v43  ;;  %2280 = vmatprep.mubr.f32.mxu1 %v1874_v4  ;;  %v2184_v4 = vld [vmem:[#allocation7 + $0x300] sm:$0xff]  ;;  %v2378_v43 = vld [vmem:[#allocation9 + $0x70] sm:$0xff] }
 0x316   : > { %4259 = vmatpush3.msra.mxu0 %v2095_v46  ;;  %4294 = vmatpush3.msra.mxu1 %v2198_v9  ;;  %v2294_v46 = vld [vmem:[#allocation9 + $0x28] sm:$0xff] }
 0x317   : > { %4260 = vmatprep.subr.mxu0 %v2110_v10  ;;  %4295 = vmatprep.subr.mxu1 %v2213_v11  ;;  %v2377_v9 = vld [vmem:[#allocation9 + $0x68] sm:$0xff]  ;;  %v2376_v10 = vld [vmem:[#allocation9 + $0x60] sm:$0xff]  ;;  %v2292_v11 = vld [vmem:[#allocation9 + $0x18] sm:$0xff] }
 0x318   : > { %4261 = vmatpush3.msra.mxu0 %v2094_v12  ;;  %4296 = vmatpush3.msra.mxu1 %v2197_v13  ;;  %v2375_v12 = vld [vmem:[#allocation9 + $0x58] sm:$0xff]  ;;  %v2291_v13 = vld [vmem:[#allocation9 + $0x10] sm:$0xff] }
 0x319   : > { %4262 = vmatprep.subr.mxu0 %v2109_v14  ;;  %4297 = vmatprep.subr.mxu1 %v2212_v15  ;;  %v2374_v14 = vld [vmem:[#allocation9 + $0x50] sm:$0xff]  ;;  %v2290_v15 = vld [vmem:[#allocation9 + $0x8] sm:$0xff] }
 0x31a   : > { %4263 = vmatpush3.msra.mxu0 %v2093_v16  ;;  %4298 = vmatpush3.msra.mxu1 %v2196_v17  ;;  %v2373_v16 = vld [vmem:[#allocation9 + $0x48] sm:$0xff]  ;;  %v2289_v17 = vld [vmem:[#allocation9] sm:$0xff] }
 0x31b   : > { %4264 = vmatprep.subr.mxu0 %v2108_v18  ;;  %4299 = vmatprep.subr.mxu1 %v2211_v19  ;;  %v2372_v18 = vld [vmem:[#allocation9 + $0x40] sm:$0xff] }
 0x31c   : > { %4265 = vmatpush3.msra.mxu0 %v2092_v20  ;;  %4300 = vmatpush3.msra.mxu1 %v2195_v21 }
 0x31d   : > { %4266 = vmatprep.subr.mxu0 %v2107_v22  ;;  %4301 = vmatprep.subr.mxu1 %v2210_v23 }
 0x31e   : > { %4267 = vmatpush3.msra.mxu0 %v2091_v24  ;;  %4302 = vmatpush3.msra.mxu1 %v2194_v25 }
 0x31f   : > { %4268 = vmatprep.subr.mxu0 %v2106_v26  ;;  %4303 = vmatprep.subr.mxu1 %v2209_v27 }
 0x320   : > { %4269 = vmatpush3.msra.mxu0 %v2090_v28  ;;  %4304 = vmatpush3.msra.mxu1 %v2193_v29 }
 0x321   : > { %4270 = vmatprep.subr.mxu0 %v2105_v30  ;;  %4305 = vmatprep.subr.mxu1 %v2208_v31 }
 0x322   : > { %4271 = vmatpush3.msra.mxu0 %v2089_v32  ;;  %4306 = vmatpush3.msra.mxu1 %v2192_v33 }
 0x323   : > { %4272 = vmatprep.subr.mxu0 %v2104_v34  ;;  %4307 = vmatprep.subr.mxu1 %v2207_v35  ;;  %v2452_v34 = vld [vmem:[#allocation2 + $0x4] sm:$0xf]  ;;  %v2450_v35 = vld [vmem:[#allocation2] sm:$0xf] }
 0x324   : > { %4273 = vmatpush3.msra.mxu0 %v2088_v36  ;;  %4308 = vmatpush3.msra.mxu1 %v2191_v37 }
 0x325   : > { %4274 = vmatprep.subr.mxu0 %v2103_v38  ;;  %4309 = vmatprep.subr.mxu1 %v2206_v39  ;;  %v2692_v38 = vld [vmem:[#allocation2 + $0xc] sm:$0xf] }
 0x326   : > { %4275 = vmatpush3.msra.mxu0 %v2087_v40  ;;  %4310 = vmatpush3.msra.mxu1 %v2190_v41  ;;  %v2605_v41 = vld [vmem:[#allocation2 + $0x8] sm:$0xf] }
 0x327   : > { %4276 = vmatprep.subr.mxu0 %v2102_v42  ;;  %4311 = vmatprep.subr.mxu1 %v2205_v44  ;;  %v2690_v42 = vld [vmem:[%s5465_s9 + $0x38] sm:$0xff] }
 0x328   : > { %4277 = vmatpush3.msra.mxu0 %v2086_v45  ;;  %4312 = vmatpush3.msra.mxu1 %v2189_v47  ;;  %v2689_v45 = vld [vmem:[%s5465_s9 + $0x30] sm:$0xff] }
 0x329   : > { %4278 = vmatprep.subr.mxu0 %v2101_v48  ;;  %4313 = vmatprep.subr.mxu1 %v2204_v49  ;;  %v2694_v48 = vld [vmem:[#allocation2 + $0x10] sm:$0xf]  ;;  %v2688_v49 = vld [vmem:[%s5465_s9 + $0x28] sm:$0xff] }
 0x32a   : > { %4279 = vmatpush3.msra.mxu0 %v2085_v50  ;;  %4314 = vmatpush3.msra.mxu1 %v2188_v51  ;;  %v2842_v50 = vld [vmem:[#allocation2 + $0x14] sm:$0xf]  ;;  %v2687_v51 = vld [vmem:[%s5465_s9 + $0x20] sm:$0xff] }
 0x32b   : > { %4280 = vmatprep.subr.mxu0 %v2100_v52  ;;  %4315 = vmatprep.subr.mxu1 %v2203_v53  ;;  %v2993_v52 = vld [vmem:[#allocation2 + $0x1c] sm:$0xf]  ;;  %v2991_v53 = vld [vmem:[#allocation2 + $0x18] sm:$0xf] }
 0x32c   : > { %4281 = vmatpush3.msra.mxu0 %v2084_v54  ;;  %4316 = vmatpush3.msra.mxu1 %v2187_v55  ;;  %v3141_v54 = vld [vmem:[#allocation2 + $0x20] sm:$0xf]  ;;  %v2686_v55 = vld [vmem:[%s5465_s9 + $0x18] sm:$0xff] }
 0x32d   : > { %4282 = vmatprep.subr.mxu0 %v2099_v56  ;;  %4317 = vmatprep.subr.mxu1 %v2202_v57  ;;  %v2685_v56 = vld [vmem:[%s5465_s9 + $0x10] sm:$0xff]  ;;  %v2684_v57 = vld [vmem:[%s5465_s9 + $0x8] sm:$0xff] }
 0x32e   : > { %4283 = vmatpush3.msra.mxu0 %v2083_v58  ;;  %4318 = vmatpush3.msra.mxu1 %v2186_v59  ;;  %v2683_v58 = vld [vmem:[%s5465_s9] sm:$0xff]  ;;  %v4168_v59 = vld [vmem:[%s5465_s9 + $0x78] sm:$0xff] }
 0x32f   : > { %4284 = vmatprep.subr.mxu0 %v2098_v60  ;;  %4319 = vmatprep.subr.mxu1 %v2201_v61  ;;  %v4167_v60 = vld [vmem:[%s5465_s9 + $0x70] sm:$0xff]  ;;  %v4166_v61 = vld [vmem:[%s5465_s9 + $0x68] sm:$0xff] }
 0x330   : > { %4285 = vmatpush3.msra.mxu0 %v2082_v62  ;;  %4320 = vmatpush3.msra.mxu1 %v2185_v63  ;;  %v4165_v62 = vld [vmem:[%s5465_s9 + $0x60] sm:$0xff]  ;;  %v4164_v63 = vld [vmem:[%s5465_s9 + $0x58] sm:$0xff] }
 0x331   : > { %4286 = vmatprep.subr.mxu0 %v2097_v0  ;;  %4321 = vmatprep.subr.mxu1 %v2200_v1  ;;  %v4163_v0 = vld [vmem:[%s5465_s9 + $0x50] sm:$0xff]  ;;  %v4162_v1 = vld [vmem:[%s5465_s9 + $0x48] sm:$0xff] }
 0x332   : > { %4287 = vmatpush3.msra.mxu0 %v2081_v3  ;;  %4322 = vmatpush3.msra.mxu1 %v2184_v4  ;;  %v4161_v3 = vld [vmem:[%s5465_s9 + $0x40] sm:$0xff] }
 0x333   : > { %2178 = vmatmul.mubr.f32.vlgmr.msra.gmra.mxu0 %v5222_v5  ;;  %2281 = vmatmul.mubr.f32.vlgmr.msra.gmra.mxu1 %v5222_v5  ;;  %v2293_v5 = vld [vmem:[#allocation9 + $0x20] sm:$0xff] }
 0x334   : > { %4424 = vmatprep.subr.mxu0 %v4920_v2  ;;  %4443 = vmatprep.subr.mxu1 %v4920_v2 }
 0x335   : > { %4425 = vmatpush3.msra.mxu0 %v2296_v6  ;;  %4444 = vmatpush3.msra.mxu1 %v2379_v7 }
 0x336   : > { %4426 = vmatprep.subr.mxu0 %v4920_v2  ;;  %4445 = vmatprep.subr.mxu1 %v4920_v2 }
 0x337   : > { %4427 = vmatpush3.msra.mxu0 %v2295_v8  ;;  %4446 = vmatpush3.msra.mxu1 %v2378_v43 }
 0x338   : > { %4428 = vmatprep.subr.mxu0 %v4920_v2  ;;  %4447 = vmatprep.subr.mxu1 %v4920_v2 }
 0x339   : > { %4429 = vmatpush3.msra.mxu0 %v2294_v46  ;;  %4448 = vmatpush3.msra.mxu1 %v2377_v9 }
 0x33a   : > { %4430 = vmatprep.subr.mxu0 %v4920_v2  ;;  %4449 = vmatprep.subr.mxu1 %v4920_v2 }
 0x33b   : > { %4431 = vmatpush3.msra.mxu0 %v2293_v5  ;;  %4450 = vmatpush3.msra.mxu1 %v2376_v10 }
 0x33c   : > { %4432 = vmatprep.subr.mxu0 %v4920_v2  ;;  %4451 = vmatprep.subr.mxu1 %v4920_v2 }
 0x33d   : > { %4433 = vmatpush3.msra.mxu0 %v2292_v11  ;;  %4452 = vmatpush3.msra.mxu1 %v2375_v12 }
 0x33e   : > { %4434 = vmatprep.subr.mxu0 %v4920_v2  ;;  %4453 = vmatprep.subr.mxu1 %v4920_v2 }
 0x33f   : > { %4435 = vmatpush3.msra.mxu0 %v2291_v13  ;;  %4454 = vmatpush3.msra.mxu1 %v2374_v14 }
 0x340   : > { %4436 = vmatprep.subr.mxu0 %v4920_v2  ;;  %4455 = vmatprep.subr.mxu1 %v4920_v2 }
 0x341   : > { %4437 = vmatpush3.msra.mxu0 %v2290_v15  ;;  %4456 = vmatpush3.msra.mxu1 %v2373_v16 }
 0x342   : > { %4438 = vmatprep.subr.mxu0 %v4920_v2  ;;  %4457 = vmatprep.subr.mxu1 %v4920_v2 }
 0x343   : > { %4439 = vmatpush3.msra.mxu0 %v2289_v17  ;;  %4440 = vmatprep.mubr.msk.f32.mxu0 %vm4922_vm2, %v4920_v2 }
 0x344   : > { %4458 = vmatpush3.msra.mxu1 %v2372_v18  ;;  %4459 = vmatprep.mubr.msk.f32.mxu1 %vm4922_vm2, %v4920_v2 }
 0x345   : > { %4462 = vmatprep.subr.mxu0 %v4920_v2  ;;  %4482 = vmatprep.subr.mxu1 %v4920_v2 }
 0x3d2   : > { %v4218_v19 = vpop.f32.mrf.mxu0  ;;  %v4253_v20 = vpop.f32.mrf.mxu1 }
 0x3d4   : > { %v4219_v21 = vpop.f32.mrf.mxu0  ;;  %v4254_v22 = vpop.f32.mrf.mxu1 }
 0x3d5   : > { %v4220_v25 = vadd.f32 %v4219_v21, %v4218_v19  ;;  %v4255_v26 = vadd.f32 %v4254_v22, %v4253_v20 }
 0x3d7   : > { %v2286_v31 = vmax.f32 %v4220_v25, %v4255_v26  ;;  %v3396_v25 = vld [vmem:[#allocation10 + $0x78] sm:$0xff]  ;;  %v3313_v26 = vld [vmem:[#allocation10 + $0x30] sm:$0xff] }
 0x3f3   : > { %v4288_v23 = vpop.f32.mrf.mxu0  ;;  %v4323_v24 = vpop.f32.mrf.mxu1 }
 0x3f5   : > { %v4289_v27 = vpop.f32.mrf.mxu0  ;;  %v4324_v28 = vpop.f32.mrf.mxu1 }
 0x3f6   : > { %v4290_v29 = vadd.f32 %v4289_v27, %v4288_v23  ;;  %v4325_v30 = vadd.f32 %v4324_v28, %v4323_v24  ;;  %v3314_v24 = vld [vmem:[#allocation10 + $0x38] sm:$0xff]  ;;  %v3395_v27 = vld [vmem:[#allocation10 + $0x70] sm:$0xff]  ;;  %v3312_v28 = vld [vmem:[#allocation10 + $0x28] sm:$0xff] }
 0x3f8   : > { %v2287_v32 = vmax.f32 %v4290_v29, %v4325_v30  ;;  %v3394_v29 = vld [vmem:[#allocation10 + $0x68] sm:$0xff]  ;;  %v3311_v30 = vld [vmem:[#allocation10 + $0x20] sm:$0xff] }
 0x3fa   : > { %v2288_v33 = vmax.f32 %v2286_v31, %v2287_v32  ;;  %v3393_v31 = vld [vmem:[#allocation10 + $0x60] sm:$0xff]  ;;  %v3310_v32 = vld [vmem:[#allocation10 + $0x18] sm:$0xff] }
 0x3fc   : > { %4441 = vmatmul.mubr.msk.f32.vlgmr.msra.gmra.mxu0 %vm2297_vm3, %v2288_v33  ;;  %4460 = vmatmul.mubr.msk.f32.vlgmr.msra.gmra.mxu1 %vm2297_vm3, %v2288_v33 }
 0x3fd   : > { %4463 = vmatpush3.msk.msra.mxu0 %vm892_vm0, %v2288_v33  ;;  %4464 = vmatprep.mubr.msk.f32.mxu0 %vm4922_vm2, %v4920_v2 }
 0x3fe   : > { %4467 = vmatprep.subr.mxu0 %v4920_v2  ;;  %4484 = vmatprep.mubr.msk.f32.mxu1 %vm4922_vm2, %v4920_v2 }
 0x400   : > { %4465 = vmatmul.mubr.msk.f32.vlgmr.msra.gmra.mxu0 %vm888_vm1, %v2452_v34  ;;  %v3309_v34 = vld [vmem:[#allocation10 + $0x10] sm:$0xff] }
 0x401   : > { %4469 = vmatprep.mubr.msk.f32.mxu0 %vm4922_vm2, %v4920_v2 }
 0x4bc   : > { %v2367_v36 = vpop.f32.mrf.mxu0  ;;  %v2446_v37 = vpop.f32.mrf.mxu1 }
 0x4bd   : > { %4468 = vmatpush3.msk.msra.mxu0 %vm892_vm0, %v2367_v36  ;;  %4483 = vmatpush3.msk.msra.mxu1 %vm892_vm0, %v2367_v36 }
 0x4be   : > { %v4442_v39 = vpop.f32.mrf.mxu0  ;;  %v4461_v40 = vpop.f32.mrf.mxu1  ;;  %4470 = vmatmul.mubr.msk.f32.vlgmr.msra.gmra.mxu0 %vm888_vm1, %v2450_v35  ;;  %4472 = vmatprep.subr.mxu0 %v4920_v2  ;;  %v3391_v35 = vld [vmem:[#allocation10 + $0x50] sm:$0xff] }
 0x4bf   : > { %4473 = vmatpush3.msk.msra.mxu0 %vm892_vm0, %v2446_v37  ;;  %4474 = vmatprep.mubr.msk.f32.mxu0 %vm4922_vm2, %v4920_v2  ;;  %v3389_v39 = vld [vmem:[#allocation10 + $0x40] sm:$0xff] }
 0x4c0   : > { %4477 = vmatprep.subr.mxu0 %v4920_v2  ;;  %4485 = vmatmul.mubr.msk.f32.vlgmr.msra.gmra.mxu1 %vm888_vm1, %v2692_v38  ;;  %v5273_v44 = vpop.f32.mrf.mxu0  ;;  %v3307_v38 = vld [vmem:[#allocation10] sm:$0xff] }
 0x4c1   : > { %4492 = vmatprep.subr.mxu1 %v4920_v2  ;;  %4508 = vmatprep.mubr.msk.f32.mxu1 %vm4922_vm2, %v4920_v2 }
 0x4c2   : > { %4475 = vmatmul.mubr.msk.f32.vlgmr.msra.gmra.mxu0 %vm888_vm1, %v2605_v41  ;;  %4493 = vmatpush3.msra.mxu1 %v2690_v42  ;;  %v4466_v47 = vpop.f32.mrf.mxu0 }
 0x4c3   : > { %4478 = vmatpush3.msk.msra.mxu0 %vm892_vm0, %v2288_v33  ;;  %4479 = vmatprep.mubr.msk.f32.mxu0 %vm4922_vm2, %v4920_v2  ;;  %v3303_v47 = vpop.permute.xlu0 %3302 }
 0x4c4   : > { %4487 = vmatprep.subr.mxu0 %v4920_v2  ;;  %4494 = vmatprep.subr.mxu1 %v4920_v2 }
 0x4c5   : > { %4495 = vmatpush3.msra.mxu1 %v2689_v45 }
 0x4c6   : > { %4480 = vmatmul.mubr.msk.f32.vlgmr.msra.gmra.mxu0 %vm888_vm1, %v2694_v48  ;;  %4496 = vmatprep.subr.mxu1 %v4920_v2 }
 0x4c7   : > { %4488 = vmatpush3.msk.msra.mxu0 %vm892_vm0, %v2446_v37  ;;  %4489 = vmatprep.mubr.msk.f32.mxu0 %vm4922_vm2, %v4920_v2 }
 0x4c8   : > { %4511 = vmatprep.subr.mxu0 %v4920_v2  ;;  %4497 = vmatpush3.msra.mxu1 %v2688_v49 }
 0x4c9   : > { %4498 = vmatprep.subr.mxu1 %v4920_v2 }
 0x4ca   : > { %4490 = vmatmul.mubr.msk.f32.vlgmr.msra.gmra.mxu0 %vm888_vm1, %v2842_v50  ;;  %4499 = vmatpush3.msra.mxu1 %v2687_v51  ;;  %v3475_v51 = vld [vmem:[#allocation10 + $0xb8] sm:$0xff] }
 0x4cb   : > { %4512 = vmatpush3.msk.msra.mxu0 %vm892_vm0, %v2288_v33  ;;  %4513 = vmatprep.mubr.msk.f32.mxu0 %vm4922_vm2, %v4920_v2  ;;  %v3392_v33 = vld [vmem:[#allocation10 + $0x58] sm:$0xff] }
 0x4cc   : > { %4516 = vmatprep.subr.mxu0 %v4920_v2  ;;  %4500 = vmatprep.subr.mxu1 %v4920_v2 }
 0x4cd   : > { %4501 = vmatpush3.msra.mxu1 %v2686_v55  ;;  %v3473_v55 = vld [vmem:[#allocation10 + $0xa8] sm:$0xff] }
 0x4ce   : > { %4514 = vmatmul.mubr.msk.f32.vlgmr.msra.gmra.mxu0 %vm888_vm1, %v2993_v52  ;;  %4502 = vmatprep.subr.mxu1 %v4920_v2  ;;  %v3554_v52 = vld [vmem:[#allocation10 + $0xf8] sm:$0xff] }
 0x4cf   : > { %4517 = vmatpush3.msk.msra.mxu0 %vm892_vm0, %v2367_v36  ;;  %4518 = vmatprep.mubr.msk.f32.mxu0 %vm4922_vm2, %v4920_v2  ;;  %v3308_v36 = vld [vmem:[#allocation10 + $0x8] sm:$0xff] }
 0x4d0   : > { %4521 = vmatprep.subr.mxu0 %v4920_v2  ;;  %4503 = vmatpush3.msra.mxu1 %v2685_v56  ;;  %v3552_v56 = vld [vmem:[#allocation10 + $0xe8] sm:$0xff] }
 0x4d1   : > { %4504 = vmatprep.subr.mxu1 %v4920_v2 }
 0x4d2   : > { %4519 = vmatmul.mubr.msk.f32.vlgmr.msra.gmra.mxu0 %vm888_vm1, %v2991_v53  ;;  %4505 = vmatpush3.msra.mxu1 %v2684_v57  ;;  %v3474_v53 = vld [vmem:[#allocation10 + $0xb0] sm:$0xff]  ;;  %v3472_v57 = vld [vmem:[#allocation10 + $0xa0] sm:$0xff] }
 0x4d3   : > { %4522 = vmatpush3.msk.msra.mxu0 %vm892_vm0, %v2446_v37  ;;  %4523 = vmatprep.mubr.msk.f32.mxu0 %vm4922_vm2, %v4920_v2  ;;  %v3390_v37 = vld [vmem:[#allocation10 + $0x48] sm:$0xff] }
 0x4d4   : > { %4526 = vmatprep.subr.mxu0 %v4920_v2  ;;  %4506 = vmatprep.subr.mxu1 %v4920_v2 }
 0x4d5   : > { %4507 = vmatpush3.msra.mxu1 %v2683_v58  ;;  %v3551_v58 = vld [vmem:[#allocation10 + $0xe0] sm:$0xff] }
 0x4d6   : > { %4524 = vmatmul.mubr.msk.f32.vlgmr.msra.gmra.mxu0 %vm888_vm1, %v3141_v54  ;;  %4545 = vmatprep.subr.mxu1 %v4920_v2  ;;  %v3553_v54 = vld [vmem:[#allocation10 + $0xf0] sm:$0xff] }
 0x4d7   : > { %4542 = vmatprep.mubr.msk.f32.mxu0 %vm4922_vm2, %v4920_v2  ;;  %4527 = vmatpush3.msra.mxu0 %v4168_v59  ;;  %v3471_v59 = vld [vmem:[#allocation10 + $0x98] sm:$0xff] }
 0x4d8   : > { %4528 = vmatprep.subr.mxu0 %v4920_v2 }
 0x4d9   : > { %4529 = vmatpush3.msra.mxu0 %v4167_v60  ;;  %v3550_v60 = vld [vmem:[#allocation10 + $0xd8] sm:$0xff] }
 0x4da   : > { %4530 = vmatprep.subr.mxu0 %v4920_v2 }
 0x4db   : > { %4531 = vmatpush3.msra.mxu0 %v4166_v61  ;;  %v3470_v61 = vld [vmem:[#allocation10 + $0x90] sm:$0xff] }
 0x4dc   : > { %4532 = vmatprep.subr.mxu0 %v4920_v2 }
 0x4dd   : > { %4533 = vmatpush3.msra.mxu0 %v4165_v62  ;;  %v3549_v62 = vld [vmem:[#allocation10 + $0xd0] sm:$0xff] }
 0x4de   : > { %4534 = vmatprep.subr.mxu0 %v4920_v2 }
 0x4df   : > { %4535 = vmatpush3.msra.mxu0 %v4164_v63  ;;  %v3469_v63 = vld [vmem:[#allocation10 + $0x88] sm:$0xff] }
 0x4e0   : > { %4536 = vmatprep.subr.mxu0 %v4920_v2 }
 0x4e1   : > { %4537 = vmatpush3.msra.mxu0 %v4163_v0  ;;  %v3548_v0 = vld [vmem:[#allocation10 + $0xc8] sm:$0xff] }
 0x4e2   : > { %4538 = vmatprep.subr.mxu0 %v4920_v2 }
 0x4e3   : > { %4539 = vmatpush3.msra.mxu0 %v4162_v1  ;;  %v3468_v1 = vld [vmem:[#allocation10 + $0x80] sm:$0xff] }
 0x4e4   : > { %4540 = vmatprep.subr.mxu0 %v4920_v2 }
 0x4e5   : > { %4541 = vmatpush3.msra.mxu0 %v4161_v3  ;;  %v3547_v3 = vld [vmem:[#allocation10 + $0xc0] sm:$0xff] }
 0x4e6   : > { %4564 = vmatprep.subr.mxu0 %v4920_v2 }
 0x57e   : > { %v2600_v4 = vpop.f32.mrf.mxu0 }
 0x57f   : > { %v2601_v8 = vadd.f32 %v2600_v4, %v5273_v44 }
 0x580   : > { %v4471_v6 = vpop.f32.mrf.mxu0  ;;  %v2837_v7 = vpop.f32.mrf.mxu1 }
 0x582   : > { %v2678_v43 = vpop.f32.mrf.mxu0  ;;  %v4486_v46 = vpop.f32.mrf.mxu1 }
 0x583   : > { %v2682_v9 = vadd.f32 %v2678_v43, %v2601_v8 }
 0x584   : > { %v4476_v5 = vpop.f32.mrf.mxu0 }
 0x585   : > { %4509 = vmatmul.mubr.msk.f32.vlgmr.msra.gmra.mxu1 %vm2297_vm3, %v2682_v9 }
 0x586   : > { %v2764_v10 = vpop.f32.mrf.mxu0  ;;  %4561 = vmatprep.mubr.msk.f32.mxu1 %vm4922_vm2, %v4920_v2  ;;  %4546 = vmatpush3.msra.mxu1 %v3314_v24 }
 0x587   : > { %v2838_v11 = vadd.f32 %v2837_v7, %v2764_v10  ;;  %4547 = vmatprep.subr.mxu1 %v4920_v2 }
 0x588   : > { %v4481_v12 = vpop.f32.mrf.mxu0  ;;  %4548 = vmatpush3.msra.mxu1 %v3313_v26 }
 0x589   : > { %4549 = vmatprep.subr.mxu1 %v4920_v2 }
 0x58a   : > { %v2912_v13 = vpop.f32.mrf.mxu0  ;;  %4550 = vmatpush3.msra.mxu1 %v3312_v28 }
 0x58b   : > { %v2916_v14 = vadd.f32 %v2912_v13, %v2838_v11  ;;  %4551 = vmatprep.subr.mxu1 %v4920_v2  ;;  %v3628_v13 = vld [vmem:[%s5468_s12] sm:$0xf] }
 0x58c   : > { %v4491_v15 = vpop.f32.mrf.mxu0  ;;  %4552 = vmatpush3.msra.mxu1 %v3311_v30  ;;  %v3945_v30 = vld [vmem:[%s5470_s14] sm:$0xf] }
 0x58d   : > { %4553 = vmatprep.subr.mxu1 %v4920_v2  ;;  %v3779_v15 = vld [vmem:[%s5467_s11] sm:$0xf] }
 0x58e   : > { %v3063_v16 = vpop.f32.mrf.mxu0  ;;  %4554 = vmatpush3.msra.mxu1 %v3310_v32 }
 0x58f   : > { %4555 = vmatprep.subr.mxu1 %v4920_v2 }
 0x590   : > { %v4515_v17 = vpop.f32.mrf.mxu0  ;;  %4556 = vmatpush3.msra.mxu1 %v3309_v34 }
 0x591   : > { %4557 = vmatprep.subr.mxu1 %v4920_v2 }
 0x592   : > { %v3136_v18 = vpop.f32.mrf.mxu0  ;;  %4558 = vmatpush3.msra.mxu1 %v3308_v36 }
 0x593   : > { %v3137_v20 = vadd.f32 %v3136_v18, %v3063_v16  ;;  %4559 = vmatprep.subr.mxu1 %v4920_v2 }
 0x594   : > { %v4520_v19 = vpop.f32.mrf.mxu0  ;;  %4560 = vmatpush3.msra.mxu1 %v3307_v38 }
 0x595   : > { %4583 = vmatprep.subr.mxu1 %v4920_v2 }
 0x596   : > { %v3211_v21 = vpop.f32.mrf.mxu0 }
 0x597   : > { %v3215_v22 = vadd.f32 %v3211_v21, %v3137_v20 }
 0x598   : > { %v4525_v23 = vpop.f32.mrf.mxu0 }
 0x599   : > { %4543 = vmatmul.mubr.msk.f32.vlgmr.msra.gmra.mxu0 %vm2297_vm3, %v3215_v22 }
 0x59a   : > { %4580 = vmatprep.mubr.msk.f32.mxu0 %vm4922_vm2, %v4920_v2  ;;  %4565 = vmatpush3.msra.mxu0 %v3396_v25 }
 0x59b   : > { %4566 = vmatprep.subr.mxu0 %v4920_v2 }
 0x59c   : > { %4567 = vmatpush3.msra.mxu0 %v3395_v27 }
 0x59d   : > { %4568 = vmatprep.subr.mxu0 %v4920_v2 }
 0x59e   : > { %4569 = vmatpush3.msra.mxu0 %v3394_v29 }
 0x59f   : > { %4570 = vmatprep.subr.mxu0 %v4920_v2 }
 0x5a0   : > { %4571 = vmatpush3.msra.mxu0 %v3393_v31 }
 0x5a1   : > { %4572 = vmatprep.subr.mxu0 %v4920_v2 }
 0x5a2   : > { %4573 = vmatpush3.msra.mxu0 %v3392_v33 }
 0x5a3   : > { %4574 = vmatprep.subr.mxu0 %v4920_v2 }
 0x5a4   : > { %4575 = vmatpush3.msra.mxu0 %v3391_v35  ;;  %v3951_v35 = vld [vmem:[%s5471_s15] sm:$0xf] }
 0x5a5   : > { %4576 = vmatprep.subr.mxu0 %v4920_v2 }
 0x5a6   : > { %4577 = vmatpush3.msra.mxu0 %v3390_v37 }
 0x5a7   : > { %4578 = vmatprep.subr.mxu0 %v4920_v2 }
 0x5a8   : > { %4579 = vmatpush3.msra.mxu0 %v3389_v39 }
 0x5a9   : > { %4602 = vmatprep.subr.mxu0 %v4920_v2 }
 0x645   : > { %v2986_v40 = vpop.f32.mrf.mxu1 }
 0x646   : > { %v2987_v42 = vadd.f32 %v2986_v40, %v2916_v14  ;;  %v3705_v14 = vld [vmem:[%s5469_s13] sm:$0xf]  ;;  %v4923_v40 = vmov 839922192  }
 0x647   : > { %v4510_v41 = vpop.f32.mrf.mxu1 }
 0x648   : > { %v3960_v41 = vunpack.c.l.s4 %v4923_v40 }
 0x659   : > { %v3294_v44 = vpop.f32.mrf.mxu0 }
 0x65a   : > { %v3298_v45 = vadd.f32 %v3294_v44, %v2987_v42  ;;  %v3962_v42 = vlaneseq  ;;  %v3961_v44 = vunpack.c.0.s8 %v3960_v41 }
 0x65b   : > { %v4544_v48 = vpop.f32.mrf.mxu0 }
 0x65c   : > { %v3305_v49 = vadd.f32 %v3303_v47, %v3298_v45  ;;  %v3963_v45 = vshrl.u32 %v3962_v42, 7 }
 0x65e   : > { %v3306_v50 = vmax.f32 %v3305_v49, 0.0  ;;  %v3964_v47 = vsub.s32 %v3961_v44, %v3963_v45 }
 0x660   : > { %4562 = vmatmul.mubr.msk.f32.vlgmr.msra.gmra.mxu1 %vm2297_vm3, %v3306_v50  ;;  %4581 = vmatmul.mubr.msk.f32.vlgmr.msra.gmra.mxu0 %vm2297_vm3, %v3306_v50 }
 0x661   : > { %4584 = vmatpush3.msra.mxu1 %v3475_v51  ;;  %4603 = vmatpush3.msra.mxu0 %v3554_v52 }
 0x662   : > { %4585 = vmatprep.subr.mxu1 %v4920_v2  ;;  %4604 = vmatprep.subr.mxu0 %v4920_v2 }
 0x663   : > { %4586 = vmatpush3.msra.mxu1 %v3474_v53  ;;  %4605 = vmatpush3.msra.mxu0 %v3553_v54 }
 0x664   : > { %4587 = vmatprep.subr.mxu1 %v4920_v2  ;;  %4606 = vmatprep.subr.mxu0 %v4920_v2 }
 0x665   : > { %4588 = vmatpush3.msra.mxu1 %v3473_v55  ;;  %4607 = vmatpush3.msra.mxu0 %v3552_v56 }
 0x666   : > { %4589 = vmatprep.subr.mxu1 %v4920_v2  ;;  %4608 = vmatprep.subr.mxu0 %v4920_v2 }
 0x667   : > { %4590 = vmatpush3.msra.mxu1 %v3472_v57  ;;  %4609 = vmatpush3.msra.mxu0 %v3551_v58 }
 0x668   : > { %4591 = vmatprep.subr.mxu1 %v4920_v2  ;;  %4610 = vmatprep.subr.mxu0 %v4920_v2 }
 0x669   : > { %4592 = vmatpush3.msra.mxu1 %v3471_v59  ;;  %4611 = vmatpush3.msra.mxu0 %v3550_v60 }
 0x66a   : > { %4593 = vmatprep.subr.mxu1 %v4920_v2  ;;  %4612 = vmatprep.subr.mxu0 %v4920_v2 }
 0x66b   : > { %4594 = vmatpush3.msra.mxu1 %v3470_v61  ;;  %4613 = vmatpush3.msra.mxu0 %v3549_v62 }
 0x66c   : > { %4595 = vmatprep.subr.mxu1 %v4920_v2  ;;  %4614 = vmatprep.subr.mxu0 %v4920_v2 }
 0x66d   : > { %4596 = vmatpush3.msra.mxu1 %v3469_v63  ;;  %4615 = vmatpush3.msra.mxu0 %v3548_v0 }
 0x66e   : > { %4597 = vmatprep.subr.mxu1 %v4920_v2  ;;  %4616 = vmatprep.subr.mxu0 %v4920_v2 }
 0x66f   : > { %4598 = vmatpush3.msra.mxu1 %v3468_v1  ;;  %4599 = vmatprep.mubr.msk.f32.mxu1 %vm4922_vm2, %v4920_v2 }
 0x670   : > { %4617 = vmatpush3.msra.mxu0 %v3547_v3  ;;  %4618 = vmatprep.mubr.msk.f32.mxu0 %vm4922_vm2, %v4920_v2 }
 0x671   : > { %4600 = vmatmul.mubr.msk.f32.vlgmr.msra.gmra.mxu1 %vm2297_vm3, %v3306_v50  ;;  %4619 = vmatmul.mubr.msk.f32.vlgmr.msra.gmra.mxu0 %vm2297_vm3, %v3306_v50  ;;  %v4727_v50 = vld [vmem:[%s5135_s22] sm:$0xff] }
 0x672   : > { %4621 = vmatprep.subr.mxu1 %v4920_v2  ;;  %4623 = vmatprep.mubr.msk.f32.mxu1 %vm4922_vm2, %v4920_v2 }
 0x720   : > { %v3384_v4 = vpop.f32.mrf.mxu1  ;;  %v3463_v6 = vpop.f32.mrf.mxu0 }
 0x721   : > { %v3625_v9 = vmax.f32 %v3384_v4, %v3463_v6 }
 0x722   : > { %v4563_v7 = vpop.f32.mrf.mxu1  ;;  %v4582_v8 = vpop.f32.mrf.mxu0 }
 0x731   : > { %v3542_v43 = vpop.f32.mrf.mxu1  ;;  %v3621_v46 = vpop.f32.mrf.mxu0 }
 0x732   : > { %v3626_v5 = vmax.f32 %v3542_v43, %v3621_v46 }
 0x733   : > { %v4601_v10 = vpop.f32.mrf.mxu1  ;;  %v4620_v11 = vpop.f32.mrf.mxu0 }
 0x734   : > { %v3627_v12 = vmax.f32 %v3625_v9, %v3626_v5 }
 0x736   : > { %4622 = vmatpush3.msk.msra.mxu1 %vm892_vm0, %v3627_v12 }
 0x737   : > { %4624 = vmatmul.mubr.msk.f32.vlgmr.msra.gmra.mxu1 %vm888_vm1, %v3628_v13  ;;  %4626 = vmatprep.subr.mxu1 %v4920_v2 }
 0x738   : > { %4627 = vmatpush3.msk.msra.mxu1 %vm892_vm0, %v3627_v12  ;;  %4628 = vmatprep.mubr.msk.f32.mxu1 %vm4922_vm2, %v4920_v2 }
 0x739   : > { %4631 = vmatprep.subr.mxu1 %v4920_v2 }
 0x73b   : > { %4629 = vmatmul.mubr.msk.f32.vlgmr.msra.gmra.mxu1 %vm888_vm1, %v3705_v14 }
 0x73c   : > { %4633 = vmatprep.mubr.msk.f32.mxu1 %vm4922_vm2, %v4920_v2 }
 0x7f7   : > { %v3701_v16 = vpop.f32.mrf.mxu1 }
 0x7f8   : > { %4632 = vmatpush3.msk.msra.mxu1 %vm892_vm0, %v3701_v16 }
 0x7f9   : > { %v4625_v17 = vpop.f32.mrf.mxu1  ;;  %4634 = vmatmul.mubr.msk.f32.vlgmr.msra.gmra.mxu1 %vm888_vm1, %v3779_v15  ;;  %4636 = vmatprep.subr.mxu1 %v4920_v2 }
 0x7fa   : > { %4638 = vmatprep.mubr.msk.f32.mxu1 %vm4922_vm2, %v4920_v2 }
 0x7fb   : > { %v3775_v18 = vpop.f32.mrf.mxu1 }
 0x7fc   : > { %4637 = vmatpush3.xpose.msk.msra.mxu1 %vm3868_vm4, %v3775_v18 }
 0x7fd   : > { %v4630_v19 = vpop.f32.mrf.mxu1 }
 0x8b9   : > { %v3852_v20 = vpop.f32.mrf.mxu1 }
 0x8ba   : > { %v3857_v21 = vsel %vm3856_vm5, %v3852_v20, -inf }
 0x8bb   : > { %3858 = vmax.xlane.f32.xlu1 %v3857_v21  ;;  %v4635_v22 = vpop.f32.mrf.mxu1 }
 0x944   : > { %v3859_v23 = vpop.xlane.xlu1 %3858 }
 0x945   : > { %v3860_v24 = vsub.f32 %v3852_v20, %v3859_v23 }
 0x947   : > { %v3861_v25 = vmul.f32 1.442695, %v3860_v24 }
 0x949   : > { %4723 = vpow2.f32 %v3861_v25 }
 0x956   : > { %v4724_v26 = vpop.eup %4723 }
 0x957   : > { %v3863_v27 = vsel %vm3856_vm5, %v4724_v26, 0.0 }
 0x958   : > { %3864 = vadd.xlane.f32.xlu1 %v3863_v27 }
 0x9e1   : > { %v3865_v28 = vpop.xlane.xlu1 %3864 }
 0x9e2   : > { %4725 = vrcp.f32 %v3865_v28 }
 0x9ef   : > { %v4726_v2 = vpop.eup %4725 }
 0x9f0   : > { %v3867_v29 = vmul.f32 %v4726_v2, %v4724_v26 }
 0x9f2   : > { %4639 = vmatmul.mubr.msk.f32.vlgmr.msra.gmra.mxu1 %vm3868_vm4, %v3867_v29 }
 0xab2   : > { %v3941_v31 = vpop.f32.mrf.mxu1 }
 0xab3   : > { %v3946_v32 = vmul.f32 %v3945_v30, %v3941_v31 }
 0xab4   : > { %v4640_v33 = vpop.f32.mrf.mxu1 }
 0xab5   : > { %v3948_v34 = vsel %vm3947_vm6, %v3946_v32, 0.0 }
 0xab6   : > { %3949 = vadd.xlane.f32.xlu0 %v3948_v34 }
 0xb3f   : > { %v3950_v36 = vpop.xlane.xlu0 %3949 }
 0xb40   : > { %v3952_v37 = vadd.f32 %v3951_v35, %v3950_v36 }
 0xb42   : > { %v3953_v38 = vmax.f32 %v3952_v37, 0.0 }
 0xb44   : > { %v3954_v39 = vadd.f32 1.0, %v3953_v38 }
 0xb46   : > { %3957 = vperm.xlu1 %4721, %v3954_v39  }
 0xbc1   : > { %v3958_v48 = vpop.permute.xlu1 %3957 }
 0xbc2   : > { %v3965_v49 = vrot.slane %v3958_v48, %v3964_v47 }
 0xbc4   : > { %v3967_v51 = vmul.f32 %v4727_v50, %v3965_v49 }
 0xbc6   : > { %3968 = vst [vmem:[%s609_s30] sm:$0xff] %v3967_v51 }
 0xbc7 PF: > { %s30_s21 = sadd.s32 1, %s4906_s21  }
 0xbc8   : > { %p27_p3 = scmp.ge.s32.totalorder %s30_s21, 4  }
 0xbca   :  { %29 = sbr.rel (!%p27_p3) target bundleno = 7 (0x7), region = 165 }
 0xbcf   :  { %3990 = vsyncpa [#allocation3], 1 }
 0xbd0   :  { %3992 = vsyncpa [#allocation3 + $0x1], 1 }
 0xbd1   :  { %3993 = vsyncpa [#allocation5], 1 }
 0xbd2   :  { %3994 = vsyncpa [#allocation8], 1 }
 0xbd3   :  { %3995 = vsyncpa [#allocation11], 1 }

</bundles_post_ra>
